<compile_context>
chip_gen: v7x
topology: tpu7x:2x2x1
jax: 0.10.0
libtpu: 0.0.40
codegen_flags: <defaults>
</compile_context>

<pallas_src>
import jax
import jax.numpy as jnp
from jax.experimental import pallas as pl
from jax.experimental.pallas import tpu as pltpu


# ------------------------------- helpers ----------------------------------- #

def _pick_block_m(m, target=256):
    """Largest convenient row tile that divides M (multiples of 16 for bf16)."""
    for t in (target, 512, 256, 128, 64, 32, 16):
        if t <= m and m % t == 0:
            return t
    return m


# ----------------------------- Pallas kernels ------------------------------ #

def _fused_1x1_bn_relu_kernel(x_ref, w_ref, b_ref, o_ref):
    """relu(x @ w + b): the three branch-entry 1x1 convs fused into one matmul.
    x: [TM, C] f32, w: [C, 96] bf16, b: [1, 96] f32, o: [TM, 96] bf16."""
    y = jnp.dot(x_ref[...].astype(jnp.bfloat16), w_ref[...],
                preferred_element_type=jnp.float32)
    o_ref[...] = jnp.maximum(y + b_ref[...], 0.0).astype(o_ref.dtype)


def _conv3x3_bn_relu_kernel(xp_ref, w_ref, b_ref, o_ref):
    """3x3 / stride 1 / pad 1 conv + folded BN + ReLU, one image per grid step.
    The 9 taps are accumulated in-kernel (no im2col through HBM).
    xp: [1, H+2, W+2, Cin] f32 (pre-padded), w: [9, Cin, Cout] bf16,
    b: [1, Cout] f32, o: [1, H, W, Cout] f32."""
    _, hp, wp, cin = xp_ref.shape
    h, w = hp - 2, wp - 2
    cout = o_ref.shape[-1]
    xp = xp_ref[0]                                         # [H+2, W+2, Cin]
    acc = jnp.zeros((h * w, cout), jnp.float32)
    for t in range(9):
        dy, dx = divmod(t, 3)
        win = xp[dy:dy + h, dx:dx + w, :]                  # [H, W, Cin]
        win = win.reshape(h * w, cin).astype(jnp.bfloat16)
        acc = acc + jnp.dot(win, w_ref[t], preferred_element_type=jnp.float32)
    y = jnp.maximum(acc + b_ref[...], 0.0)
    o_ref[0] = y.reshape(h, w, cout)


def _tb_residual_relu_kernel(b1_ref, b2_ref, b3_ref, x_ref, w_ref, bias_ref, o_ref):
    """relu(b1@W1 + b2@W2 + b3@W3 + bias + x): tb 1x1 conv consuming the three
    branch outputs directly (the [M,96] concat never hits HBM) + residual."""
    acc = jnp.dot(b1_ref[...].astype(jnp.bfloat16), w_ref[0],
                  preferred_element_type=jnp.float32)
    acc = acc + jnp.dot(b2_ref[...].astype(jnp.bfloat16), w_ref[1],
                        preferred_element_type=jnp.float32)
    acc = acc + jnp.dot(b3_ref[...].astype(jnp.bfloat16), w_ref[2],
                        preferred_element_type=jnp.float32)
    o_ref[...] = jnp.maximum(acc + bias_ref[...] + x_ref[...], 0.0)


# --------------------------- pallas_call wrappers --------------------------- #

def fused_branch_entry(x2d, w, b, block_m=256):
    m, c = x2d.shape
    n_out = w.shape[1]
    tm = _pick_block_m(m, block_m)
    return pl.pallas_call(
        _fused_1x1_bn_relu_kernel,
        out_shape=jax.ShapeDtypeStruct((m, n_out), jnp.bfloat16),
        grid=(m // tm,),
        in_specs=[
            pl.BlockSpec((tm, c), lambda i: (i, 0)),
            pl.BlockSpec((c, n_out), lambda i: (0, 0)),
            pl.BlockSpec((1, n_out), lambda i: (0, 0)),
        ],
        out_specs=pl.BlockSpec((tm, n_out), lambda i: (i, 0)),
        compiler_params=pltpu.CompilerParams(dimension_semantics=("parallel",)),
        cost_estimate=pl.CostEstimate(
            flops=2 * m * c * n_out, transcendentals=0,
            bytes_accessed=m * c * 4 + c * n_out * 2 + n_out * 4 + m * n_out * 2),
    )(x2d, w, b)


def conv3x3_bn_relu(x_nhwc, w9, b):
    n, h, w, cin = x_nhwc.shape
    cout = w9.shape[-1]
    # Zero padding is cheap JAX glue; the 9-tap loop runs inside the kernel.
    xp = jnp.pad(x_nhwc.astype(jnp.float32), ((0, 0), (1, 1), (1, 1), (0, 0)))
    return pl.pallas_call(
        _conv3x3_bn_relu_kernel,
        out_shape=jax.ShapeDtypeStruct((n, h, w, cout), jnp.float32),
        grid=(n,),
        in_specs=[
            pl.BlockSpec((1, h + 2, w + 2, cin), lambda i: (i, 0, 0, 0)),
            pl.BlockSpec((9, cin, cout), lambda i: (0, 0, 0)),
            pl.BlockSpec((1, cout), lambda i: (0, 0)),
        ],
        out_specs=pl.BlockSpec((1, h, w, cout), lambda i: (i, 0, 0, 0)),
        compiler_params=pltpu.CompilerParams(dimension_semantics=("parallel",)),
        cost_estimate=pl.CostEstimate(
            flops=2 * n * h * w * 9 * cin * cout, transcendentals=0,
            bytes_accessed=(n * (h + 2) * (w + 2) * cin * 4 + 9 * cin * cout * 2
                            + cout * 4 + n * h * w * cout * 4)),
    )(xp, w9, b)


def tb_residual_relu(b1, b2, b3, x2d, w_tb, bias, block_m=256):
    m, c = x2d.shape
    cout = w_tb.shape[-1]
    tm = _pick_block_m(m, block_m)
    aliases = {3: 0} if c == cout else {}   # residual buffer reused as output
    return pl.pallas_call(
        _tb_residual_relu_kernel,
        out_shape=jax.ShapeDtypeStruct((m, cout), jnp.float32),
        grid=(m // tm,),
        in_specs=[
            pl.BlockSpec((tm, 32), lambda i: (i, 0)),
            pl.BlockSpec((tm, 32), lambda i: (i, 0)),
            pl.BlockSpec((tm, 32), lambda i: (i, 0)),
            pl.BlockSpec((tm, c), lambda i: (i, 0)),
            pl.BlockSpec((3, 32, cout), lambda i: (0, 0, 0)),
            pl.BlockSpec((1, cout), lambda i: (0, 0)),
        ],
        out_specs=pl.BlockSpec((tm, cout), lambda i: (i, 0)),
        input_output_aliases=aliases,
        compiler_params=pltpu.CompilerParams(dimension_semantics=("parallel",)),
        cost_estimate=pl.CostEstimate(
            flops=2 * m * 96 * cout, transcendentals=0,
            bytes_accessed=(m * 32 * 2 + 2 * m * 32 * 4 + m * c * 4
                            + 96 * cout * 2 + cout * 4 + m * cout * 4)),
    )(b1, b2, b3, x2d, w_tb, bias)


# -------------------------- params (BN folded) ------------------------------ #

def _fold_bn(w2d, conv_b, gamma, beta, mean, var, eps=1e-5):
    """Fold eval-mode BatchNorm2d into the conv weight matrix and bias."""
    scale = gamma / jnp.sqrt(var + eps)                      # [Cout]
    w_fold = (w2d * scale[None, :]).astype(jnp.float32)      # [K, Cout]
    b_fold = ((conv_b - mean) * scale + beta).reshape(1, -1).astype(jnp.float32)
    return w_fold, b_fold


def _make_basic_conv_params(key, kh, kw, cin, cout):
    """Deterministic synthetic BasicConv2d (conv w/b + BN stats), folded."""
    kw_, kb, kg, kbe, km, kv = jax.random.split(key, 6)
    w = 0.05 * jax.random.normal(kw_, (kh, kw, cin, cout), jnp.float32)   # HWIO
    conv_b = 0.10 * jax.random.normal(kb, (cout,), jnp.float32)
    gamma = 1.0 + 0.10 * jax.random.normal(kg, (cout,), jnp.float32)
    beta = 0.10 * jax.random.normal(kbe, (cout,), jnp.float32)
    mean = 0.10 * jax.random.normal(km, (cout,), jnp.float32)
    var = 1.0 + 0.10 * jnp.abs(jax.random.normal(kv, (cout,), jnp.float32))
    return _fold_bn(w.reshape(kh * kw * cin, cout), conv_b, gamma, beta, mean, var)


def init_params(key, in_channels):
    assert in_channels == 128, "residual add (b_out + x) requires in_channels == 128"
    shapes = {
        "b1":   (1, 1, in_channels, 32),
        "b2_1": (1, 1, in_channels, 32),
        "b2_2": (3, 3, 32, 32),
        "b3_1": (1, 1, in_channels, 32),
        "b3_2": (3, 3, 32, 32),
        "b3_3": (3, 3, 32, 32),
        "tb":   (1, 1, 96, 128),
    }
    raw = {}
    for k, (name, shp) in zip(jax.random.split(key, len(shapes)), shapes.items()):
        raw[name] = _make_basic_conv_params(k, *shp)   # (w2d [K,Cout] f32, b [1,Cout] f32)

    params = {}
    # Fused branch-entry 1x1 convs: concat folded weights along Cout -> [C, 96].
    params["branch_in"] = {
        "w": jnp.concatenate([raw["b1"][0], raw["b2_1"][0], raw["b3_1"][0]],
                             axis=1).astype(jnp.bfloat16),
        "b": jnp.concatenate([raw["b1"][1], raw["b2_1"][1], raw["b3_1"][1]], axis=1),
    }
    # 3x3 convs: folded weights reshaped to per-tap [9, Cin, Cout] (dy-major).
    for name in ("b2_2", "b3_2", "b3_3"):
        w2d, b = raw[name]
        params[name] = {"w": w2d.reshape(9, 32, 32).astype(jnp.bfloat16), "b": b}
    # tb 1x1 conv: folded [96, 128] weight split into three [32, 128] slices.
    w_tb, b_tb = raw["tb"]
    params["tb"] = {"w": w_tb.reshape(3, 32, 128).astype(jnp.bfloat16), "b": b_tb}
    return params


# ------------------------------- forward ------------------------------------ #

def inception_resnet_a(x_nchw, params, *, block_m=256):
    """Forward pass matching the PyTorch module (eval-mode BN)."""
    n, c, h, w = x_nchw.shape
    m = n * h * w
    x2d = jnp.transpose(x_nchw, (0, 2, 3, 1)).reshape(m, c)   # NCHW -> NHWC glue

    # b1 | b2_1 | b3_1 fused into one matmul (+ folded BN + ReLU).
    be = fused_branch_entry(x2d, params["branch_in"]["w"],
                            params["branch_in"]["b"], block_m)       # [M, 96] bf16
    b1 = be[:, 0:32]
    b2 = conv3x3_bn_relu(be[:, 32:64].reshape(n, h, w, 32),
                         params["b2_2"]["w"], params["b2_2"]["b"])
    b3 = conv3x3_bn_relu(be[:, 64:96].reshape(n, h, w, 32),
                         params["b3_2"]["w"], params["b3_2"]["b"])
    b3 = conv3x3_bn_relu(b3, params["b3_3"]["w"], params["b3_3"]["b"])
    # (the extra F.relu after b3_1 in the PyTorch code is idempotent -> dropped)

    out2d = tb_residual_relu(b1, b2.reshape(m, 32), b3.reshape(m, 32), x2d,
                             params["tb"]["w"], params["tb"]["b"], block_m)
    return jnp.transpose(out2d.reshape(n, h, w, 128), (0, 3, 1, 2))   # -> NCHW


# ------------------------------ reference ----------------------------------- #

def _reference(x_nchw, params):
    """Plain-JAX reference using the same bf16-operand / f32-accumulate math."""
    n, c, h, w = x_nchw.shape
    x2d = jnp.transpose(x_nchw, (0, 2, 3, 1)).reshape(n * h * w, c)

    def mm(a, wgt):
        return jnp.dot(a.astype(jnp.bfloat16), wgt, preferred_element_type=jnp.float32)

    be = jnp.maximum(mm(x2d, params["branch_in"]["w"]) + params["branch_in"]["b"], 0.0)

    def c3(a2d, p):
        ap = jnp.pad(a2d.reshape(n, h, w, 32).astype(jnp.float32),
                     ((0, 0), (1, 1), (1, 1), (0, 0)))
        acc = jnp.zeros((n * h * w, 32), jnp.float32)
        for t in range(9):
            dy, dx = divmod(t, 3)
            win = ap[:, dy:dy + h, dx:dx + w, :].reshape(n * h * w, 32)
            acc = acc + mm(win, p["w"][t])
        return jnp.maximum(acc + p["b"], 0.0)

    b1 = be[:, 0:32]
    b2 = c3(be[:, 32:64], params["b2_2"])
    b3 = c3(c3(be[:, 64:96], params["b3_2"]), params["b3_3"])
    y = (mm(b1, params["tb"]["w"][0]) + mm(b2, params["tb"]["w"][1])
         + mm(b3, params["tb"]["w"][2]) + params["tb"]["b"] + x2d)
    return jnp.transpose(jnp.maximum(y, 0.0).reshape(n, h, w, 128), (0, 3, 1, 2))


if __name__ == "__main__":
    key = jax.random.PRNGKey(0)
    k_param, k_x = jax.random.split(key)

    # Small but representative shapes; the residual (b_out + x) fixes C == 128.
    N, C, H, W = 2, 128, 16, 16
    x = jax.random.normal(k_x, (N, C, H, W), jnp.float32)
    params = init_params(k_param, C)

    fwd = jax.jit(inception_resnet_a)
    out = jax.block_until_ready(fwd(x, params))

    assert out.shape == (N, 128, H, W), out.shape
    assert bool(jnp.all(jnp.isfinite(out)))

    ref = _reference(x, params)
    assert bool(jnp.allclose(out, ref, rtol=2e-2, atol=2e-2)), \
        float(jnp.max(jnp.abs(out - ref)))

    print("KERNEL_OK")
</pallas_src>

<mosaic_0001>
module attributes {stable_mosaic.version = 11 : i64} {
  func.func @_fused_1x1_bn_relu_kernel(%arg0: i32, %arg1: memref<256x128xf32, #tpu.memory_space<vmem>>, %arg2: memref<128x96xbf16, #tpu.memory_space<vmem>>, %arg3: memref<1x96xf32, #tpu.memory_space<vmem>>, %arg4: memref<256x96xbf16, #tpu.memory_space<vmem>>) attributes {dimension_semantics = [#tpu.dimension_semantics<parallel>], iteration_bounds = array<i64: 2>, scalar_prefetch = 0 : i64, scratch_operands = 0 : i64, tpu.core_type = #tpu.core_type<tc>, window_params = [{transform_indices = @transform_0, window_bounds = array<i64: 256, 128>}, {pipeline_mode = #tpu.pipeline_mode<synchronous>, transform_indices = @transform_1, window_bounds = array<i64: 128, 96>}, {pipeline_mode = #tpu.pipeline_mode<synchronous>, transform_indices = @transform_2, window_bounds = array<i64: 1, 96>}, {transform_indices = @transform_3, window_bounds = array<i64: 256, 96>}]} {
    %c0 = arith.constant 0 : index
    %c0_0 = arith.constant 0 : index
    %0 = vector.load %arg1[%c0, %c0_0] : memref<256x128xf32, #tpu.memory_space<vmem>>, vector<256x128xf32>
    %1 = arith.truncf %0 : vector<256x128xf32> to vector<256x128xbf16>
    %c0_1 = arith.constant 0 : index
    %c0_2 = arith.constant 0 : index
    %2 = vector.load %arg2[%c0_1, %c0_2] : memref<128x96xbf16, #tpu.memory_space<vmem>>, vector<128x96xbf16>
    %cst = arith.constant dense<0.000000e+00> : vector<256x96xf32>
    %3 = tpu.matmul %1, %2, %cst {dimension_numbers = #tpu.dot_dimension_numbers<[1], [0], [0], [1], [0, 0, 1, 1], [], []>} : vector<256x128xbf16>, vector<128x96xbf16>, vector<256x96xf32> -> vector<256x96xf32>
    %c0_3 = arith.constant 0 : index
    %c0_4 = arith.constant 0 : index
    %4 = vector.load %arg3[%c0_3, %c0_4] : memref<1x96xf32, #tpu.memory_space<vmem>>, vector<1x96xf32>
    %5 = vector.broadcast %4 : vector<1x96xf32> to vector<256x96xf32>
    %6 = arith.addf %3, %5 : vector<256x96xf32>
    %cst_5 = arith.constant 0.000000e+00 : f32
    %7 = vector.broadcast %cst_5 : f32 to vector<256x96xf32>
    %8 = arith.maximumf %6, %7 : vector<256x96xf32>
    %9 = arith.truncf %8 : vector<256x96xf32> to vector<256x96xbf16>
    %c0_6 = arith.constant 0 : index
    %c0_7 = arith.constant 0 : index
    %10 = vector.load %arg4[%c0_6, %c0_7] : memref<256x96xbf16, #tpu.memory_space<vmem>>, vector<256x96xbf16>
    tpu.vector_store %arg4[%c0_6, %c0_7], %9 {strides = array<i32>} : memref<256x96xbf16, #tpu.memory_space<vmem>>, vector<256x96xbf16>,
    return
  }
  func.func @transform_0(%arg0: i32) -> (i32, i32) {
    %c0_i32 = arith.constant 0 : i32
    %c0_i32_0 = arith.constant 0 : i32
    return %arg0, %c0_i32 : i32, i32
  }
  func.func @transform_1(%arg0: i32) -> (i32, i32) {
    %c0_i32 = arith.constant 0 : i32
    %c0_i32_0 = arith.constant 0 : i32
    %c0_i32_1 = arith.constant 0 : i32
    return %c0_i32, %c0_i32_0 : i32, i32
  }
  func.func @transform_2(%arg0: i32) -> (i32, i32) {
    %c0_i32 = arith.constant 0 : i32
    %c0_i32_0 = arith.constant 0 : i32
    %c0_i32_1 = arith.constant 0 : i32
    return %c0_i32, %c0_i32_0 : i32, i32
  }
  func.func @transform_3(%arg0: i32) -> (i32, i32) {
    %c0_i32 = arith.constant 0 : i32
    %c0_i32_0 = arith.constant 0 : i32
    return %arg0, %c0_i32 : i32, i32
  }
}

module attributes {stable_mosaic.version = 11 : i64} {
  func.func @_conv3x3_bn_relu_kernel(%arg0: i32, %arg1: memref<1x18x18x32xf32, #tpu.memory_space<vmem>>, %arg2: memref<9x32x32xbf16, #tpu.memory_space<vmem>>, %arg3: memref<1x32xf32, #tpu.memory_space<vmem>>, %arg4: memref<1x16x16x32xf32, #tpu.memory_space<vmem>>) attributes {dimension_semantics = [#tpu.dimension_semantics<parallel>], iteration_bounds = array<i64: 2>, scalar_prefetch = 0 : i64, scratch_operands = 0 : i64, tpu.core_type = #tpu.core_type<tc>, window_params = [{transform_indices = @transform_0, window_bounds = array<i64: 1, 18, 18, 32>}, {pipeline_mode = #tpu.pipeline_mode<synchronous>, transform_indices = @transform_1, window_bounds = array<i64: 9, 32, 32>}, {pipeline_mode = #tpu.pipeline_mode<synchronous>, transform_indices = @transform_2, window_bounds = array<i64: 1, 32>}, {transform_indices = @transform_3, window_bounds = array<i64: 1, 16, 16, 32>}]} {
    %c0 = arith.constant 0 : index
    %c0_0 = arith.constant 0 : index
    %c0_1 = arith.constant 0 : index
    %c0_2 = arith.constant 0 : index
    %0 = vector.load %arg1[%c0, %c0_0, %c0_1, %c0_2] : memref<1x18x18x32xf32, #tpu.memory_space<vmem>>, vector<1x18x18x32xf32>
    %1 = vector.shape_cast %0 : vector<1x18x18x32xf32> to vector<18x18x32xf32>
    %cst = arith.constant 0.000000e+00 : f32
    %2 = vector.broadcast %cst : f32 to vector<256x32xf32>
    %3 = vector.extract_strided_slice %1 {offsets = [0, 0, 0], sizes = [16, 16, 32], strides = [1, 1, 1]} : vector<18x18x32xf32> to vector<16x16x32xf32>
    %4 = vector.shape_cast %3 : vector<16x16x32xf32> to vector<256x32xf32>
    %5 = arith.truncf %4 : vector<256x32xf32> to vector<256x32xbf16>
    %c0_3 = arith.constant 0 : index
    %c0_4 = arith.constant 0 : index
    %c0_5 = arith.constant 0 : index
    %6 = vector.load %arg2[%c0_3, %c0_4, %c0_5] : memref<9x32x32xbf16, #tpu.memory_space<vmem>>, vector<1x32x32xbf16>
    %7 = vector.shape_cast %6 : vector<1x32x32xbf16> to vector<32x32xbf16>
    %cst_6 = arith.constant dense<0.000000e+00> : vector<256x32xf32>
    %8 = tpu.matmul %5, %7, %cst_6 {dimension_numbers = #tpu.dot_dimension_numbers<[1], [0], [0], [1], [0, 0, 1, 1], [], []>} : vector<256x32xbf16>, vector<32x32xbf16>, vector<256x32xf32> -> vector<256x32xf32>
    %9 = arith.addf %2, %8 : vector<256x32xf32>
    %10 = vector.extract_strided_slice %1 {offsets = [0, 1, 0], sizes = [16, 16, 32], strides = [1, 1, 1]} : vector<18x18x32xf32> to vector<16x16x32xf32>
    %11 = vector.shape_cast %10 : vector<16x16x32xf32> to vector<256x32xf32>
    %12 = arith.truncf %11 : vector<256x32xf32> to vector<256x32xbf16>
    %c1 = arith.constant 1 : index
    %c0_7 = arith.constant 0 : index
    %c0_8 = arith.constant 0 : index
    %13 = vector.load %arg2[%c1, %c0_7, %c0_8] : memref<9x32x32xbf16, #tpu.memory_space<vmem>>, vector<1x32x32xbf16>
    %14 = vector.shape_cast %13 : vector<1x32x32xbf16> to vector<32x32xbf16>
    %cst_9 = arith.constant dense<0.000000e+00> : vector<256x32xf32>
    %15 = tpu.matmul %12, %14, %cst_9 {dimension_numbers = #tpu.dot_dimension_numbers<[1], [0], [0], [1], [0, 0, 1, 1], [], []>} : vector<256x32xbf16>, vector<32x32xbf16>, vector<256x32xf32> -> vector<256x32xf32>
    %16 = arith.addf %9, %15 : vector<256x32xf32>
    %17 = vector.extract_strided_slice %1 {offsets = [0, 2, 0], sizes = [16, 16, 32], strides = [1, 1, 1]} : vector<18x18x32xf32> to vector<16x16x32xf32>
    %18 = vector.shape_cast %17 : vector<16x16x32xf32> to vector<256x32xf32>
    %19 = arith.truncf %18 : vector<256x32xf32> to vector<256x32xbf16>
    %c2 = arith.constant 2 : index
    %c0_10 = arith.constant 0 : index
    %c0_11 = arith.constant 0 : index
    %20 = vector.load %arg2[%c2, %c0_10, %c0_11] : memref<9x32x32xbf16, #tpu.memory_space<vmem>>, vector<1x32x32xbf16>
    %21 = vector.shape_cast %20 : vector<1x32x32xbf16> to vector<32x32xbf16>
    %cst_12 = arith.constant dense<0.000000e+00> : vector<256x32xf32>
    %22 = tpu.matmul %19, %21, %cst_12 {dimension_numbers = #tpu.dot_dimension_numbers<[1], [0], [0], [1], [0, 0, 1, 1], [], []>} : vector<256x32xbf16>, vector<32x32xbf16>, vector<256x32xf32> -> vector<256x32xf32>
    %23 = arith.addf %16, %22 : vector<256x32xf32>
    %24 = vector.extract_strided_slice %1 {offsets = [1, 0, 0], sizes = [16, 16, 32], strides = [1, 1, 1]} : vector<18x18x32xf32> to vector<16x16x32xf32>
    %25 = vector.shape_cast %24 : vector<16x16x32xf32> to vector<256x32xf32>
    %26 = arith.truncf %25 : vector<256x32xf32> to vector<256x32xbf16>
    %c3 = arith.constant 3 : index
    %c0_13 = arith.constant 0 : index
    %c0_14 = arith.constant 0 : index
    %27 = vector.load %arg2[%c3, %c0_13, %c0_14] : memref<9x32x32xbf16, #tpu.memory_space<vmem>>, vector<1x32x32xbf16>
    %28 = vector.shape_cast %27 : vector<1x32x32xbf16> to vector<32x32xbf16>
    %cst_15 = arith.constant dense<0.000000e+00> : vector<256x32xf32>
    %29 = tpu.matmul %26, %28, %cst_15 {dimension_numbers = #tpu.dot_dimension_numbers<[1], [0], [0], [1], [0, 0, 1, 1], [], []>} : vector<256x32xbf16>, vector<32x32xbf16>, vector<256x32xf32> -> vector<256x32xf32>
    %30 = arith.addf %23, %29 : vector<256x32xf32>
    %31 = vector.extract_strided_slice %1 {offsets = [1, 1, 0], sizes = [16, 16, 32], strides = [1, 1, 1]} : vector<18x18x32xf32> to vector<16x16x32xf32>
    %32 = vector.shape_cast %31 : vector<16x16x32xf32> to vector<256x32xf32>
    %33 = arith.truncf %32 : vector<256x32xf32> to vector<256x32xbf16>
    %c4 = arith.constant 4 : index
    %c0_16 = arith.constant 0 : index
    %c0_17 = arith.constant 0 : index
    %34 = vector.load %arg2[%c4, %c0_16, %c0_17] : memref<9x32x32xbf16, #tpu.memory_space<vmem>>, vector<1x32x32xbf16>
    %35 = vector.shape_cast %34 : vector<1x32x32xbf16> to vector<32x32xbf16>
    %cst_18 = arith.constant dense<0.000000e+00> : vector<256x32xf32>
    %36 = tpu.matmul %33, %35, %cst_18 {dimension_numbers = #tpu.dot_dimension_numbers<[1], [0], [0], [1], [0, 0, 1, 1], [], []>} : vector<256x32xbf16>, vector<32x32xbf16>, vector<256x32xf32> -> vector<256x32xf32>
    %37 = arith.addf %30, %36 : vector<256x32xf32>
    %38 = vector.extract_strided_slice %1 {offsets = [1, 2, 0], sizes = [16, 16, 32], strides = [1, 1, 1]} : vector<18x18x32xf32> to vector<16x16x32xf32>
    %39 = vector.shape_cast %38 : vector<16x16x32xf32> to vector<256x32xf32>
    %40 = arith.truncf %39 : vector<256x32xf32> to vector<256x32xbf16>
    %c5 = arith.constant 5 : index
    %c0_19 = arith.constant 0 : index
    %c0_20 = arith.constant 0 : index
    %41 = vector.load %arg2[%c5, %c0_19, %c0_20] : memref<9x32x32xbf16, #tpu.memory_space<vmem>>, vector<1x32x32xbf16>
    %42 = vector.shape_cast %41 : vector<1x32x32xbf16> to vector<32x32xbf16>
    %cst_21 = arith.constant dense<0.000000e+00> : vector<256x32xf32>
    %43 = tpu.matmul %40, %42, %cst_21 {dimension_numbers = #tpu.dot_dimension_numbers<[1], [0], [0], [1], [0, 0, 1, 1], [], []>} : vector<256x32xbf16>, vector<32x32xbf16>, vector<256x32xf32> -> vector<256x32xf32>
    %44 = arith.addf %37, %43 : vector<256x32xf32>
    %45 = vector.extract_strided_slice %1 {offsets = [2, 0, 0], sizes = [16, 16, 32], strides = [1, 1, 1]} : vector<18x18x32xf32> to vector<16x16x32xf32>
    %46 = vector.shape_cast %45 : vector<16x16x32xf32> to vector<256x32xf32>
    %47 = arith.truncf %46 : vector<256x32xf32> to vector<256x32xbf16>
    %c6 = arith.constant 6 : index
    %c0_22 = arith.constant 0 : index
    %c0_23 = arith.constant 0 : index
    %48 = vector.load %arg2[%c6, %c0_22, %c0_23] : memref<9x32x32xbf16, #tpu.memory_space<vmem>>, vector<1x32x32xbf16>
    %49 = vector.shape_cast %48 : vector<1x32x32xbf16> to vector<32x32xbf16>
    %cst_24 = arith.constant dense<0.000000e+00> : vector<256x32xf32>
    %50 = tpu.matmul %47, %49, %cst_24 {dimension_numbers = #tpu.dot_dimension_numbers<[1], [0], [0], [1], [0, 0, 1, 1], [], []>} : vector<256x32xbf16>, vector<32x32xbf16>, vector<256x32xf32> -> vector<256x32xf32>
    %51 = arith.addf %44, %50 : vector<256x32xf32>
    %52 = vector.extract_strided_slice %1 {offsets = [2, 1, 0], sizes = [16, 16, 32], strides = [1, 1, 1]} : vector<18x18x32xf32> to vector<16x16x32xf32>
    %53 = vector.shape_cast %52 : vector<16x16x32xf32> to vector<256x32xf32>
    %54 = arith.truncf %53 : vector<256x32xf32> to vector<256x32xbf16>
    %c7 = arith.constant 7 : index
    %c0_25 = arith.constant 0 : index
    %c0_26 = arith.constant 0 : index
    %55 = vector.load %arg2[%c7, %c0_25, %c0_26] : memref<9x32x32xbf16, #tpu.memory_space<vmem>>, vector<1x32x32xbf16>
    %56 = vector.shape_cast %55 : vector<1x32x32xbf16> to vector<32x32xbf16>
    %cst_27 = arith.constant dense<0.000000e+00> : vector<256x32xf32>
    %57 = tpu.matmul %54, %56, %cst_27 {dimension_numbers = #tpu.dot_dimension_numbers<[1], [0], [0], [1], [0, 0, 1, 1], [], []>} : vector<256x32xbf16>, vector<32x32xbf16>, vector<256x32xf32> -> vector<256x32xf32>
    %58 = arith.addf %51, %57 : vector<256x32xf32>
    %59 = vector.extract_strided_slice %1 {offsets = [2, 2, 0], sizes = [16, 16, 32], strides = [1, 1, 1]} : vector<18x18x32xf32> to vector<16x16x32xf32>
    %60 = vector.shape_cast %59 : vector<16x16x32xf32> to vector<256x32xf32>
    %61 = arith.truncf %60 : vector<256x32xf32> to vector<256x32xbf16>
    %c8 = arith.constant 8 : index
    %c0_28 = arith.constant 0 : index
    %c0_29 = arith.constant 0 : index
    %62 = vector.load %arg2[%c8, %c0_28, %c0_29] : memref<9x32x32xbf16, #tpu.memory_space<vmem>>, vector<1x32x32xbf16>
    %63 = vector.shape_cast %62 : vector<1x32x32xbf16> to vector<32x32xbf16>
    %cst_30 = arith.constant dense<0.000000e+00> : vector<256x32xf32>
    %64 = tpu.matmul %61, %63, %cst_30 {dimension_numbers = #tpu.dot_dimension_numbers<[1], [0], [0], [1], [0, 0, 1, 1], [], []>} : vector<256x32xbf16>, vector<32x32xbf16>, vector<256x32xf32> -> vector<256x32xf32>
    %65 = arith.addf %58, %64 : vector<256x32xf32>
    %c0_31 = arith.constant 0 : index
    %c0_32 = arith.constant 0 : index
    %66 = vector.load %arg3[%c0_31, %c0_32] : memref<1x32xf32, #tpu.memory_space<vmem>>, vector<1x32xf32>
    %67 = vector.broadcast %66 : vector<1x32xf32> to vector<256x32xf32>
    %68 = arith.addf %65, %67 : vector<256x32xf32>
    %cst_33 = arith.constant 0.000000e+00 : f32
    %69 = vector.broadcast %cst_33 : f32 to vector<256x32xf32>
    %70 = arith.maximumf %68, %69 : vector<256x32xf32>
    %71 = vector.shape_cast %70 : vector<256x32xf32> to vector<16x16x32xf32>
    %c0_34 = arith.constant 0 : index
    %c0_35 = arith.constant 0 : index
    %c0_36 = arith.constant 0 : index
    %c0_37 = arith.constant 0 : index
    %72 = vector.load %arg4[%c0_34, %c0_35, %c0_36, %c0_37] : memref<1x16x16x32xf32, #tpu.memory_space<vmem>>, vector<1x16x16x32xf32>
    %73 = vector.shape_cast %72 : vector<1x16x16x32xf32> to vector<16x16x32xf32>
    %74 = vector.shape_cast %71 : vector<16x16x32xf32> to vector<1x16x16x32xf32>
    tpu.vector_store %arg4[%c0_34, %c0_35, %c0_36, %c0_37], %74 {strides = array<i32>} : memref<1x16x16x32xf32, #tpu.memory_space<vmem>>, vector<1x16x16x32xf32>,
    return
  }
  func.func @transform_0(%arg0: i32) -> (i32, i32, i32, i32) {
    %c0_i32 = arith.constant 0 : i32
    %c0_i32_0 = arith.constant 0 : i32
    %c0_i32_1 = arith.constant 0 : i32
    %c0_i32_2 = arith.constant 0 : i32
    return %arg0, %c0_i32, %c0_i32_0, %c0_i32_1 : i32, i32, i32, i32
  }
  func.func @transform_1(%arg0: i32) -> (i32, i32, i32) {
    %c0_i32 = arith.constant 0 : i32
    %c0_i32_0 = arith.constant 0 : i32
    %c0_i32_1 = arith.constant 0 : i32
    %c0_i32_2 = arith.constant 0 : i32
    return %c0_i32, %c0_i32_0, %c0_i32_1 : i32, i32, i32
  }
  func.func @transform_2(%arg0: i32) -> (i32, i32) {
    %c0_i32 = arith.constant 0 : i32
    %c0_i32_0 = arith.constant 0 : i32
    %c0_i32_1 = arith.constant 0 : i32
    return %c0_i32, %c0_i32_0 : i32, i32
  }
  func.func @transform_3(%arg0: i32) -> (i32, i32, i32, i32) {
    %c0_i32 = arith.constant 0 : i32
    %c0_i32_0 = arith.constant 0 : i32
    %c0_i32_1 = arith.constant 0 : i32
    %c0_i32_2 = arith.constant 0 : i32
    return %arg0, %c0_i32, %c0_i32_0, %c0_i32_1 : i32, i32, i32, i32
  }
}

module attributes {stable_mosaic.version = 11 : i64} {
  func.func @_tb_residual_relu_kernel(%arg0: i32, %arg1: memref<256x32xbf16, #tpu.memory_space<vmem>>, %arg2: memref<256x32xf32, #tpu.memory_space<vmem>>, %arg3: memref<256x32xf32, #tpu.memory_space<vmem>>, %arg4: memref<256x128xf32, #tpu.memory_space<vmem>>, %arg5: memref<3x32x128xbf16, #tpu.memory_space<vmem>>, %arg6: memref<1x128xf32, #tpu.memory_space<vmem>>, %arg7: memref<256x128xf32, #tpu.memory_space<vmem>>) attributes {dimension_semantics = [#tpu.dimension_semantics<parallel>], iteration_bounds = array<i64: 2>, scalar_prefetch = 0 : i64, scratch_operands = 0 : i64, tpu.core_type = #tpu.core_type<tc>, window_params = [{transform_indices = @transform_0, window_bounds = array<i64: 256, 32>}, {transform_indices = @transform_1, window_bounds = array<i64: 256, 32>}, {transform_indices = @transform_2, window_bounds = array<i64: 256, 32>}, {transform_indices = @transform_3, window_bounds = array<i64: 256, 128>}, {pipeline_mode = #tpu.pipeline_mode<synchronous>, transform_indices = @transform_4, window_bounds = array<i64: 3, 32, 128>}, {pipeline_mode = #tpu.pipeline_mode<synchronous>, transform_indices = @transform_5, window_bounds = array<i64: 1, 128>}, {transform_indices = @transform_6, window_bounds = array<i64: 256, 128>}]} {
    %c0 = arith.constant 0 : index
    %c0_0 = arith.constant 0 : index
    %0 = vector.load %arg1[%c0, %c0_0] : memref<256x32xbf16, #tpu.memory_space<vmem>>, vector<256x32xbf16>
    %c0_1 = arith.constant 0 : index
    %c0_2 = arith.constant 0 : index
    %c0_3 = arith.constant 0 : index
    %1 = vector.load %arg5[%c0_1, %c0_2, %c0_3] : memref<3x32x128xbf16, #tpu.memory_space<vmem>>, vector<1x32x128xbf16>
    %2 = vector.shape_cast %1 : vector<1x32x128xbf16> to vector<32x128xbf16>
    %cst = arith.constant dense<0.000000e+00> : vector<256x128xf32>
    %3 = tpu.matmul %0, %2, %cst {dimension_numbers = #tpu.dot_dimension_numbers<[1], [0], [0], [1], [0, 0, 1, 1], [], []>} : vector<256x32xbf16>, vector<32x128xbf16>, vector<256x128xf32> -> vector<256x128xf32>
    %c0_4 = arith.constant 0 : index
    %c0_5 = arith.constant 0 : index
    %4 = vector.load %arg2[%c0_4, %c0_5] : memref<256x32xf32, #tpu.memory_space<vmem>>, vector<256x32xf32>
    %5 = arith.truncf %4 : vector<256x32xf32> to vector<256x32xbf16>
    %c1 = arith.constant 1 : index
    %c0_6 = arith.constant 0 : index
    %c0_7 = arith.constant 0 : index
    %6 = vector.load %arg5[%c1, %c0_6, %c0_7] : memref<3x32x128xbf16, #tpu.memory_space<vmem>>, vector<1x32x128xbf16>
    %7 = vector.shape_cast %6 : vector<1x32x128xbf16> to vector<32x128xbf16>
    %cst_8 = arith.constant dense<0.000000e+00> : vector<256x128xf32>
    %8 = tpu.matmul %5, %7, %cst_8 {dimension_numbers = #tpu.dot_dimension_numbers<[1], [0], [0], [1], [0, 0, 1, 1], [], []>} : vector<256x32xbf16>, vector<32x128xbf16>, vector<256x128xf32> -> vector<256x128xf32>
    %9 = arith.addf %3, %8 : vector<256x128xf32>
    %c0_9 = arith.constant 0 : index
    %c0_10 = arith.constant 0 : index
    %10 = vector.load %arg3[%c0_9, %c0_10] : memref<256x32xf32, #tpu.memory_space<vmem>>, vector<256x32xf32>
    %11 = arith.truncf %10 : vector<256x32xf32> to vector<256x32xbf16>
    %c2 = arith.constant 2 : index
    %c0_11 = arith.constant 0 : index
    %c0_12 = arith.constant 0 : index
    %12 = vector.load %arg5[%c2, %c0_11, %c0_12] : memref<3x32x128xbf16, #tpu.memory_space<vmem>>, vector<1x32x128xbf16>
    %13 = vector.shape_cast %12 : vector<1x32x128xbf16> to vector<32x128xbf16>
    %cst_13 = arith.constant dense<0.000000e+00> : vector<256x128xf32>
    %14 = tpu.matmul %11, %13, %cst_13 {dimension_numbers = #tpu.dot_dimension_numbers<[1], [0], [0], [1], [0, 0, 1, 1], [], []>} : vector<256x32xbf16>, vector<32x128xbf16>, vector<256x128xf32> -> vector<256x128xf32>
    %15 = arith.addf %9, %14 : vector<256x128xf32>
    %c0_14 = arith.constant 0 : index
    %c0_15 = arith.constant 0 : index
    %16 = vector.load %arg6[%c0_14, %c0_15] : memref<1x128xf32, #tpu.memory_space<vmem>>, vector<1x128xf32>
    %17 = vector.broadcast %16 : vector<1x128xf32> to vector<256x128xf32>
    %18 = arith.addf %15, %17 : vector<256x128xf32>
    %c0_16 = arith.constant 0 : index
    %c0_17 = arith.constant 0 : index
    %19 = vector.load %arg4[%c0_16, %c0_17] : memref<256x128xf32, #tpu.memory_space<vmem>>, vector<256x128xf32>
    %20 = arith.addf %18, %19 : vector<256x128xf32>
    %cst_18 = arith.constant 0.000000e+00 : f32
    %21 = vector.broadcast %cst_18 : f32 to vector<256x128xf32>
    %22 = arith.maximumf %20, %21 : vector<256x128xf32>
    %c0_19 = arith.constant 0 : index
    %c0_20 = arith.constant 0 : index
    %23 = vector.load %arg7[%c0_19, %c0_20] : memref<256x128xf32, #tpu.memory_space<vmem>>, vector<256x128xf32>
    tpu.vector_store %arg7[%c0_19, %c0_20], %22 {strides = array<i32>} : memref<256x128xf32, #tpu.memory_space<vmem>>, vector<256x128xf32>,
    return
  }
  func.func @transform_0(%arg0: i32) -> (i32, i32) {
    %c0_i32 = arith.constant 0 : i32
    %c0_i32_0 = arith.constant 0 : i32
    return %arg0, %c0_i32 : i32, i32
  }
  func.func @transform_1(%arg0: i32) -> (i32, i32) {
    %c0_i32 = arith.constant 0 : i32
    %c0_i32_0 = arith.constant 0 : i32
    return %arg0, %c0_i32 : i32, i32
  }
  func.func @transform_2(%arg0: i32) -> (i32, i32) {
    %c0_i32 = arith.constant 0 : i32
    %c0_i32_0 = arith.constant 0 : i32
    return %arg0, %c0_i32 : i32, i32
  }
  func.func @transform_3(%arg0: i32) -> (i32, i32) {
    %c0_i32 = arith.constant 0 : i32
    %c0_i32_0 = arith.constant 0 : i32
    return %arg0, %c0_i32 : i32, i32
  }
  func.func @transform_4(%arg0: i32) -> (i32, i32, i32) {
    %c0_i32 = arith.constant 0 : i32
    %c0_i32_0 = arith.constant 0 : i32
    %c0_i32_1 = arith.constant 0 : i32
    %c0_i32_2 = arith.constant 0 : i32
    return %c0_i32, %c0_i32_0, %c0_i32_1 : i32, i32, i32
  }
  func.func @transform_5(%arg0: i32) -> (i32, i32) {
    %c0_i32 = arith.constant 0 : i32
    %c0_i32_0 = arith.constant 0 : i32
    %c0_i32_1 = arith.constant 0 : i32
    return %c0_i32, %c0_i32_0 : i32, i32
  }
  func.func @transform_6(%arg0: i32) -> (i32, i32) {
    %c0_i32 = arith.constant 0 : i32
    %c0_i32_0 = arith.constant 0 : i32
    return %arg0, %c0_i32 : i32, i32
  }
}

</mosaic_0001>

<bundles_post_ra>
// kernel: inception_resnet_a.5
= control target key start
LH: loop header
LB: loop body
LE: loop exit
PB: predicated region body
PF: predicated region fallthrough
CT: control target
= control target key end

     0   :  { %s920_s12 = smov 0   ;;  %s1102_s0 = inlined_call_operand.vmem [shape: f32[512,128], index: 0, kind: input, shape index: {}]   ;;  %s1103_s1 = inlined_call_operand.vmem [shape: bf16[128,96], index: 1, kind: input, shape index: {}]   ;;  %s1104_s2 = inlined_call_operand.vmem [shape: f32[1,96], index: 2, kind: input, shape index: {}]   ;;  %s1105_s3 = inlined_call_operand.vmem [shape: bf16[512,96], index: 3, kind: output, shape index: {}]  }
   0x1 LB: > { %s704_s13 = sadd.s32 4294967295, %s898_s12   ;;  %p708_p0 = scmp.ge.s32.totalorder %s898_s12, 1  ;;  %s898_s12 = sphi %s920_s12, %s13_s12  }
   0x2   : > { %p138_p1 = scmp.lt.s32.totalorder %s898_s12, 3 }
   0x4   : > { %p139_p2 = pnand %p708_p0, %p138_p1 }
   0x5   : > { %v884_v0 = vld [vmem:[%s1103_s1] sm:$0xff] (!%p139_p2)   ;;  %s709_s16 = sshll.u32 (!%p139_p2), %s704_s13, 5  ;;  %v885_v1 = vld [vmem:[%s1103_s1 + $0x8] sm:$0xff] (!%p139_p2)   ;;  %v886_v2 = vld [vmem:[%s1103_s1 + $0x10] sm:$0xff] (!%p139_p2)   ;;  %vm615_vm0 = vcmask (!%p139_p2), 781312  }
   0x6   : > { %142 = sbr.rel (%p139_p2) target bundleno = 285 (0x11d), region = 32  ;;  %p163_p3 = scmp.lt.s32.totalorder (!%p139_p2), %s709_s16, 63  ;;  %812 = vmatprep.subr.bf16.mxu0 (!%p139_p2), %v884_v0  ;;  %860 = vmatprep.subr.bf16.mxu1 (!%p139_p2), %v884_v0  ;;  %v887_v3 = vld [vmem:[%s1103_s1 + $0x18] sm:$0xff] (!%p139_p2)   ;;  %v888_v10 = vld [vmem:[%s1103_s1 + $0x20] sm:$0xff] (!%p139_p2)   ;;  %v889_v11 = vld [vmem:[%s1103_s1 + $0x28] sm:$0xff] (!%p139_p2)  }
   0x7   : > { %813 = vmatpush3.bf16.msra.mxu0 (!%p139_p2), %v884_v0  ;;  %868 = vmatpush3.bf16.msra.mxu1 (!%p139_p2), %v884_v0  ;;  %v890_v12 = vld [vmem:[%s1103_s1 + $0x30] sm:$0xff] (!%p139_p2)   ;;  %v891_v13 = vld [vmem:[%s1103_s1 + $0x38] sm:$0xff] (!%p139_p2)   ;;  %v995_v56 = vld [vmem:[%s1104_s2] ss:$0 sm:$0xff] (!%p139_p2) }
   0x8   : > { %814 = vmatprep.subr.bf16.mxu0 (!%p139_p2), %v885_v1  ;;  %861 = vmatprep.subr.bf16.mxu1 (!%p139_p2), %v885_v1 }
   0xb   : > { %815 = vmatpush3.bf16.msra.mxu0 (!%p139_p2), %v885_v1  ;;  %869 = vmatpush3.bf16.msra.mxu1 (!%p139_p2), %v885_v1 }
   0xc   : > { %816 = vmatprep.subr.bf16.mxu0 (!%p139_p2), %v886_v2  ;;  %862 = vmatprep.subr.bf16.mxu1 (!%p139_p2), %v886_v2 }
   0xd   : > { %s1107_s16 = smov (!%p163_p3, %s709_s16), 63 }
   0xe   : > { %s710_s21 = sshll.u32 %s1107_s16, 3  ;;  %s712_s10 = sshll.u32 %s1107_s16, 2 }
   0xf   : > { %s943_s24 = scalar_lea.vmem %s1102_s0, %s710_s21  ;;  %817 = vmatpush3.bf16.msra.mxu0 %v886_v2  ;;  %870 = vmatpush3.bf16.msra.mxu1 %v886_v2  ;;  %s1007_s14 = scalar_lea.vmem %s1105_s3, %s712_s10 }
  0x10   : > { %v175_v4 = vld [vmem:[%s943_s24] sm:$0xff]  ;;  %v176_v5 = vld [vmem:[%s943_s24 + $0x8] sm:$0xff]  ;;  %818 = vmatprep.subr.bf16.mxu0 %v887_v3  ;;  %863 = vmatprep.subr.bf16.mxu1 %v887_v3  ;;  %v177_v14 = vld [vmem:[%s943_s24 + $0x10] sm:$0xff] }
  0x11   : > { %v191_v6 = vld [vmem:[%s943_s24 + $0x80] sm:$0xff]  ;;  %v207_v7 = vpack.c.bf16 %v176_v5, %v175_v4  ;;  %v192_v8 = vld [vmem:[%s943_s24 + $0x88] sm:$0xff]  ;;  %v178_v15 = vld [vmem:[%s943_s24 + $0x18] sm:$0xff] }
  0x12   : > { %v215_v9 = vpack.c.bf16 %v192_v8, %v191_v6  ;;  %v193_v16 = vld [vmem:[%s943_s24 + $0x90] sm:$0xff]  ;;  %v194_v17 = vld [vmem:[%s943_s24 + $0x98] sm:$0xff]  ;;  %v179_v18 = vld [vmem:[%s943_s24 + $0x20] sm:$0xff]  ;;  %v208_v22 = vpack.c.bf16 %v178_v15, %v177_v14 }
  0x13   : > { %828 = vmatprep.mubr.bf16.mxu0 %v207_v7  ;;  %819 = vmatpush3.bf16.msra.mxu0 %v887_v3  ;;  %v180_v19 = vld [vmem:[%s943_s24 + $0x28] sm:$0xff]  ;;  %v195_v20 = vld [vmem:[%s943_s24 + $0xa0] sm:$0xff]  ;;  %v216_v23 = vpack.c.bf16 %v194_v17, %v193_v16  ;;  %v181_v26 = vld [vmem:[%s943_s24 + $0x30] sm:$0xff] }
  0x14   : > { %844 = vmatprep.mubr.bf16.mxu1 %v215_v9  ;;  %871 = vmatpush3.bf16.msra.mxu1 %v887_v3  ;;  %v196_v21 = vld [vmem:[%s943_s24 + $0xa8] sm:$0xff]  ;;  %v209_v24 = vpack.c.bf16 %v180_v19, %v179_v18  ;;  %v182_v27 = vld [vmem:[%s943_s24 + $0x38] sm:$0xff]  ;;  %v197_v28 = vld [vmem:[%s943_s24 + $0xb0] sm:$0xff] }
  0x15   : > { %820 = vmatprep.subr.bf16.mxu0 %v888_v10  ;;  %864 = vmatprep.subr.bf16.mxu1 %v888_v10  ;;  %v217_v25 = vpack.c.bf16 %v196_v21, %v195_v20  ;;  %v198_v29 = vld [vmem:[%s943_s24 + $0xb8] sm:$0xff]  ;;  %v183_v30 = vld [vmem:[%s943_s24 + $0x40] sm:$0xff]  ;;  %v184_v31 = vld [vmem:[%s943_s24 + $0x48] sm:$0xff]  ;;  %v210_v34 = vpack.c.bf16 %v182_v27, %v181_v26 }
  0x16   : > { %v199_v32 = vld [vmem:[%s943_s24 + $0xc0] sm:$0xff]  ;;  %v200_v33 = vld [vmem:[%s943_s24 + $0xc8] sm:$0xff]  ;;  %v218_v35 = vpack.c.bf16 %v198_v29, %v197_v28  ;;  %v211_v36 = vpack.c.bf16 %v184_v31, %v183_v30  ;;  %v185_v38 = vld [vmem:[%s943_s24 + $0x50] sm:$0xff] }
  0x17   : > { %821 = vmatpush3.bf16.msra.mxu0 %v888_v10  ;;  %v219_v37 = vpack.c.bf16 %v200_v33, %v199_v32  ;;  %v186_v39 = vld [vmem:[%s943_s24 + $0x58] sm:$0xff]  ;;  %v201_v40 = vld [vmem:[%s943_s24 + $0xd0] sm:$0xff]  ;;  %v187_v42 = vld [vmem:[%s943_s24 + $0x60] sm:$0xff] }
  0x18   : > { %872 = vmatpush3.bf16.msra.mxu1 %v888_v10  ;;  %822 = vmatprep.subr.bf16.mxu0 %v889_v11  ;;  %v202_v41 = vld [vmem:[%s943_s24 + $0xd8] sm:$0xff]  ;;  %v188_v43 = vld [vmem:[%s943_s24 + $0x68] sm:$0xff]  ;;  %v203_v44 = vld [vmem:[%s943_s24 + $0xe0] sm:$0xff]  ;;  %v212_v46 = vpack.c.bf16 %v186_v39, %v185_v38 }
  0x19   : > { %865 = vmatprep.subr.bf16.mxu1 %v889_v11  ;;  %v204_v45 = vld [vmem:[%s943_s24 + $0xe8] sm:$0xff]  ;;  %v220_v47 = vpack.c.bf16 %v202_v41, %v201_v40  ;;  %v213_v48 = vpack.c.bf16 %v188_v43, %v187_v42  ;;  %v189_v50 = vld [vmem:[%s943_s24 + $0x70] sm:$0xff]  ;;  %v190_v51 = vld [vmem:[%s943_s24 + $0x78] sm:$0xff] }
  0x1a   : > { %v221_v49 = vpack.c.bf16 %v204_v45, %v203_v44  ;;  %v205_v52 = vld [vmem:[%s943_s24 + $0xf0] sm:$0xff]  ;;  %v206_v53 = vld [vmem:[%s943_s24 + $0xf8] sm:$0xff]  ;;  %v214_v54 = vpack.c.bf16 %v190_v51, %v189_v50 }
  0x1b   : > { %823 = vmatpush3.bf16.msra.mxu0 %v889_v11  ;;  %v222_v55 = vpack.c.bf16 %v206_v53, %v205_v52 }
  0x1c   : > { %873 = vmatpush3.bf16.msra.mxu1 %v889_v11  ;;  %824 = vmatprep.subr.bf16.mxu0 %v890_v12 }
  0x1d   : > { %866 = vmatprep.subr.bf16.mxu1 %v890_v12 }
  0x1f   : > { %825 = vmatpush3.bf16.msra.mxu0 %v890_v12 }
  0x20   : > { %874 = vmatpush3.bf16.msra.mxu1 %v890_v12  ;;  %826 = vmatprep.subr.bf16.mxu0 %v891_v13 }
  0x21   : > { %867 = vmatprep.subr.bf16.mxu1 %v891_v13 }
  0x23   : > { %827 = vmatpush3.bf16.msra.mxu0 %v891_v13 }
  0x24   : > { %875 = vmatpush3.bf16.msra.mxu1 %v891_v13 }
  0x26   : > { %829 = vmatmul.mubr.bf16.vlgmr.msra.gmra.mrb[0].mxu0 %v208_v22 }
  0x27   : > { %845 = vmatmul.mubr.bf16.vlgmr.msra.gmra.mrb[0].mxu1 %v216_v23  ;;  %832 = vmatprep.mubr.bf16.mxu0 %v209_v24 }
  0x28   : > { %848 = vmatprep.mubr.bf16.mxu1 %v217_v25 }
  0x2e   : > { %833 = vmatmul.mubr.bf16.gmra.mrb[4].mxu0 %v210_v34 }
  0x2f   : > { %849 = vmatmul.mubr.bf16.gmra.mrb[4].mxu1 %v218_v35  ;;  %836 = vmatprep.mubr.bf16.mxu0 %v211_v36 }
  0x30   : > { %852 = vmatprep.mubr.bf16.mxu1 %v219_v37 }
  0x36   : > { %837 = vmatmul.mubr.bf16.gmra.mrb[8].mxu0 %v212_v46 }
  0x37   : > { %853 = vmatmul.mubr.bf16.gmra.mrb[8].mxu1 %v220_v47  ;;  %840 = vmatprep.mubr.bf16.mxu0 %v213_v48 }
  0x38   : > { %856 = vmatprep.mubr.bf16.mxu1 %v221_v49 }
  0x3e   : > { %841 = vmatmul.mubr.bf16.gmra.mrb[12].mxu0 %v214_v54 }
  0x3f   : > { %857 = vmatmul.mubr.bf16.gmra.mrb[12].mxu1 %v222_v55 }
  0xf9   : > { %v830_v57 = vpop.f32.mrb[0].mxu0 }
  0xfa   : > { %v846_v58 = vpop.f32.mrb[0].mxu1  ;;  %v337_v59 = vadd.f32 %v830_v57, %v995_v56  ;;  %v328_v61 = vpop.f32.mrb[1].mxu0 }
  0xfb   : > { %v401_v60 = vadd.f32 %v846_v58, %v995_v56  ;;  %v392_v62 = vpop.f32.mrb[1].mxu1  ;;  %v329_v63 = vadd.f32 %v995_v56, %v328_v61  ;;  %v831_v1 = vpop.f32.mrb[2].mxu0 }
  0xfc   : > { %v393_v0 = vadd.f32 %v995_v56, %v392_v62  ;;  %v847_v2 = vpop.f32.mrb[2].mxu1  ;;  %v457_v3 = vmax.f32 %v337_v59, 0.0  ;;  %v340_v5 = vadd.f32 %v831_v1, %v995_v56  ;;  %v331_v7 = vpop.f32.mrb[3].mxu0 }
  0xfd   : > { %v473_v4 = vmax.f32 %v401_v60, 0.0  ;;  %v404_v6 = vadd.f32 %v847_v2, %v995_v56  ;;  %v395_v8 = vpop.f32.mrb[3].mxu1  ;;  %v455_v9 = vmax.f32 %v329_v63, 0.0  ;;  %v332_v11 = vadd.f32 %v995_v56, %v331_v7 }
  0xfe   : > { %v471_v10 = vmax.f32 %v393_v0, 0.0  ;;  %v396_v12 = vadd.f32 %v995_v56, %v395_v8  ;;  %v758_v13 = vpack.c.bf16 %v457_v3, %v457_v3  ;;  %v458_v15 = vmax.f32 %v340_v5, 0.0 }
  0xff   : > { %v774_v14 = vpack.c.bf16 %v473_v4, %v473_v4  ;;  %v474_v16 = vmax.f32 %v404_v6, 0.0  ;;  %v756_v17 = vpack.c.bf16 %v455_v9, %v455_v9  ;;  %v456_v19 = vmax.f32 %v332_v11, 0.0 }
 0x100   : > { %v772_v18 = vpack.c.bf16 %v471_v10, %v471_v10  ;;  %v472_v20 = vmax.f32 %v396_v12, 0.0  ;;  %618 = vst.msk [vmem:[%s1007_s14 + $0x8] sm:$0xf] %vm615_vm0, %v758_v13  ;;  %v759_v21 = vpack.c.bf16 %v458_v15, %v458_v15 }
 0x101   : > { %634 = vst.msk [vmem:[%s1007_s14 + $0x48] sm:$0xf] %vm615_vm0, %v774_v14  ;;  %v775_v22 = vpack.c.bf16 %v474_v16, %v474_v16  ;;  %616 = vst.msk [vmem:[%s1007_s14] sm:$0xf] %vm615_vm0, %v756_v17  ;;  %v757_v23 = vpack.c.bf16 %v456_v19, %v456_v19  ;;  %v834_v25 = vpop.f32.mrb[4].mxu0 }
 0x102   : > { %632 = vst.msk [vmem:[%s1007_s14 + $0x40] sm:$0xf] %vm615_vm0, %v772_v18  ;;  %v773_v24 = vpack.c.bf16 %v472_v20, %v472_v20  ;;  %v850_v26 = vpop.f32.mrb[4].mxu1  ;;  %619 = vst.msk [vmem:[%s1007_s14 + $0xc] sm:$0xf] %vm615_vm0, %v759_v21  ;;  %v353_v27 = vadd.f32 %v834_v25, %v995_v56  ;;  %v344_v29 = vpop.f32.mrb[5].mxu0 }
 0x103   : > { %635 = vst.msk [vmem:[%s1007_s14 + $0x4c] sm:$0xf] %vm615_vm0, %v775_v22  ;;  %v417_v28 = vadd.f32 %v850_v26, %v995_v56  ;;  %v408_v30 = vpop.f32.mrb[5].mxu1  ;;  %617 = vst.msk [vmem:[%s1007_s14 + $0x4] sm:$0xf] %vm615_vm0, %v757_v23  ;;  %v345_v31 = vadd.f32 %v995_v56, %v344_v29  ;;  %v835_v33 = vpop.f32.mrb[6].mxu0 }
 0x104   : > { %633 = vst.msk [vmem:[%s1007_s14 + $0x44] sm:$0xf] %vm615_vm0, %v773_v24  ;;  %v409_v32 = vadd.f32 %v995_v56, %v408_v30  ;;  %v851_v34 = vpop.f32.mrb[6].mxu1  ;;  %v461_v35 = vmax.f32 %v353_v27, 0.0  ;;  %v356_v37 = vadd.f32 %v835_v33, %v995_v56  ;;  %v347_v39 = vpop.f32.mrb[7].mxu0 }
 0x105   : > { %v477_v36 = vmax.f32 %v417_v28, 0.0  ;;  %v420_v38 = vadd.f32 %v851_v34, %v995_v56  ;;  %v411_v40 = vpop.f32.mrb[7].mxu1  ;;  %v459_v41 = vmax.f32 %v345_v31, 0.0  ;;  %v348_v43 = vadd.f32 %v995_v56, %v347_v39 }
 0x106   : > { %v475_v42 = vmax.f32 %v409_v32, 0.0  ;;  %v412_v44 = vadd.f32 %v995_v56, %v411_v40  ;;  %v762_v45 = vpack.c.bf16 %v461_v35, %v461_v35  ;;  %v462_v47 = vmax.f32 %v356_v37, 0.0 }
 0x107   : > { %v778_v46 = vpack.c.bf16 %v477_v36, %v477_v36  ;;  %v478_v48 = vmax.f32 %v420_v38, 0.0  ;;  %v760_v49 = vpack.c.bf16 %v459_v41, %v459_v41  ;;  %v460_v51 = vmax.f32 %v348_v43, 0.0 }
 0x108   : > { %v776_v50 = vpack.c.bf16 %v475_v42, %v475_v42  ;;  %v476_v52 = vmax.f32 %v412_v44, 0.0  ;;  %622 = vst.msk [vmem:[%s1007_s14 + $0x18] sm:$0xf] %vm615_vm0, %v762_v45  ;;  %v763_v53 = vpack.c.bf16 %v462_v47, %v462_v47 }
 0x109   : > { %638 = vst.msk [vmem:[%s1007_s14 + $0x58] sm:$0xf] %vm615_vm0, %v778_v46  ;;  %v779_v54 = vpack.c.bf16 %v478_v48, %v478_v48  ;;  %620 = vst.msk [vmem:[%s1007_s14 + $0x10] sm:$0xf] %vm615_vm0, %v760_v49  ;;  %v761_v55 = vpack.c.bf16 %v460_v51, %v460_v51  ;;  %v838_v58 = vpop.f32.mrb[8].mxu0 }
 0x10a   : > { %636 = vst.msk [vmem:[%s1007_s14 + $0x50] sm:$0xf] %vm615_vm0, %v776_v50  ;;  %v777_v57 = vpack.c.bf16 %v476_v52, %v476_v52  ;;  %v854_v59 = vpop.f32.mrb[8].mxu1  ;;  %623 = vst.msk [vmem:[%s1007_s14 + $0x1c] sm:$0xf] %vm615_vm0, %v763_v53  ;;  %v369_v60 = vadd.f32 %v838_v58, %v995_v56  ;;  %v360_v62 = vpop.f32.mrb[9].mxu0 }
 0x10b   : > { %639 = vst.msk [vmem:[%s1007_s14 + $0x5c] sm:$0xf] %vm615_vm0, %v779_v54  ;;  %v433_v61 = vadd.f32 %v854_v59, %v995_v56  ;;  %v424_v63 = vpop.f32.mrb[9].mxu1  ;;  %621 = vst.msk [vmem:[%s1007_s14 + $0x14] sm:$0xf] %vm615_vm0, %v761_v55  ;;  %v361_v0 = vadd.f32 %v995_v56, %v360_v62  ;;  %v839_v2 = vpop.f32.mrb[10].mxu0 }
 0x10c   : > { %637 = vst.msk [vmem:[%s1007_s14 + $0x54] sm:$0xf] %vm615_vm0, %v777_v57  ;;  %v425_v1 = vadd.f32 %v995_v56, %v424_v63  ;;  %v855_v3 = vpop.f32.mrb[10].mxu1  ;;  %v465_v4 = vmax.f32 %v369_v60, 0.0  ;;  %v372_v6 = vadd.f32 %v839_v2, %v995_v56  ;;  %v363_v8 = vpop.f32.mrb[11].mxu0 }
 0x10d   : > { %v481_v5 = vmax.f32 %v433_v61, 0.0  ;;  %v436_v7 = vadd.f32 %v855_v3, %v995_v56  ;;  %v427_v9 = vpop.f32.mrb[11].mxu1  ;;  %v463_v10 = vmax.f32 %v361_v0, 0.0  ;;  %v364_v12 = vadd.f32 %v995_v56, %v363_v8 }
 0x10e   : > { %v479_v11 = vmax.f32 %v425_v1, 0.0  ;;  %v428_v13 = vadd.f32 %v995_v56, %v427_v9  ;;  %v766_v14 = vpack.c.bf16 %v465_v4, %v465_v4  ;;  %v466_v16 = vmax.f32 %v372_v6, 0.0 }
 0x10f   : > { %v782_v15 = vpack.c.bf16 %v481_v5, %v481_v5  ;;  %v482_v17 = vmax.f32 %v436_v7, 0.0  ;;  %v764_v18 = vpack.c.bf16 %v463_v10, %v463_v10  ;;  %v464_v20 = vmax.f32 %v364_v12, 0.0 }
 0x110   : > { %v780_v19 = vpack.c.bf16 %v479_v11, %v479_v11  ;;  %v480_v21 = vmax.f32 %v428_v13, 0.0  ;;  %626 = vst.msk [vmem:[%s1007_s14 + $0x28] sm:$0xf] %vm615_vm0, %v766_v14  ;;  %v767_v22 = vpack.c.bf16 %v466_v16, %v466_v16 }
 0x111   : > { %642 = vst.msk [vmem:[%s1007_s14 + $0x68] sm:$0xf] %vm615_vm0, %v782_v15  ;;  %v783_v23 = vpack.c.bf16 %v482_v17, %v482_v17  ;;  %624 = vst.msk [vmem:[%s1007_s14 + $0x20] sm:$0xf] %vm615_vm0, %v764_v18  ;;  %v765_v24 = vpack.c.bf16 %v464_v20, %v464_v20  ;;  %v842_v26 = vpop.f32.mrb[12].mxu0 }
 0x112   : > { %640 = vst.msk [vmem:[%s1007_s14 + $0x60] sm:$0xf] %vm615_vm0, %v780_v19  ;;  %v781_v25 = vpack.c.bf16 %v480_v21, %v480_v21  ;;  %v858_v27 = vpop.f32.mrb[12].mxu1  ;;  %627 = vst.msk [vmem:[%s1007_s14 + $0x2c] sm:$0xf] %vm615_vm0, %v767_v22  ;;  %v385_v28 = vadd.f32 %v842_v26, %v995_v56  ;;  %v376_v30 = vpop.f32.mrb[13].mxu0 }
 0x113   : > { %643 = vst.msk [vmem:[%s1007_s14 + $0x6c] sm:$0xf] %vm615_vm0, %v783_v23  ;;  %v449_v29 = vadd.f32 %v858_v27, %v995_v56  ;;  %v440_v31 = vpop.f32.mrb[13].mxu1  ;;  %625 = vst.msk [vmem:[%s1007_s14 + $0x24] sm:$0xf] %vm615_vm0, %v765_v24  ;;  %v377_v32 = vadd.f32 %v995_v56, %v376_v30  ;;  %v843_v34 = vpop.f32.mrb[14].mxu0 }
 0x114   : > { %641 = vst.msk [vmem:[%s1007_s14 + $0x64] sm:$0xf] %vm615_vm0, %v781_v25  ;;  %v441_v33 = vadd.f32 %v995_v56, %v440_v31  ;;  %v859_v35 = vpop.f32.mrb[14].mxu1  ;;  %v469_v36 = vmax.f32 %v385_v28, 0.0  ;;  %v388_v38 = vadd.f32 %v843_v34, %v995_v56  ;;  %v379_v40 = vpop.f32.mrb[15].mxu0 }
 0x115   : > { %v485_v37 = vmax.f32 %v449_v29, 0.0  ;;  %v452_v39 = vadd.f32 %v859_v35, %v995_v56  ;;  %v443_v41 = vpop.f32.mrb[15].mxu1  ;;  %v467_v42 = vmax.f32 %v377_v32, 0.0  ;;  %v380_v44 = vadd.f32 %v995_v56, %v379_v40 }
 0x116   : > { %v483_v43 = vmax.f32 %v441_v33, 0.0  ;;  %v444_v45 = vadd.f32 %v995_v56, %v443_v41  ;;  %v770_v46 = vpack.c.bf16 %v469_v36, %v469_v36  ;;  %v470_v48 = vmax.f32 %v388_v38, 0.0 }
 0x117   : > { %v786_v47 = vpack.c.bf16 %v485_v37, %v485_v37  ;;  %v486_v49 = vmax.f32 %v452_v39, 0.0  ;;  %v768_v50 = vpack.c.bf16 %v467_v42, %v467_v42  ;;  %v468_v52 = vmax.f32 %v380_v44, 0.0 }
 0x118   : > { %v784_v51 = vpack.c.bf16 %v483_v43, %v483_v43  ;;  %v484_v53 = vmax.f32 %v444_v45, 0.0  ;;  %630 = vst.msk [vmem:[%s1007_s14 + $0x38] sm:$0xf] %vm615_vm0, %v770_v46  ;;  %v771_v54 = vpack.c.bf16 %v470_v48, %v470_v48 }
 0x119   : > { %646 = vst.msk [vmem:[%s1007_s14 + $0x78] sm:$0xf] %vm615_vm0, %v786_v47  ;;  %v787_v55 = vpack.c.bf16 %v486_v49, %v486_v49  ;;  %628 = vst.msk [vmem:[%s1007_s14 + $0x30] sm:$0xf] %vm615_vm0, %v768_v50  ;;  %v769_v56 = vpack.c.bf16 %v468_v52, %v468_v52 }
 0x11a   : > { %644 = vst.msk [vmem:[%s1007_s14 + $0x70] sm:$0xf] %vm615_vm0, %v784_v51  ;;  %v785_v57 = vpack.c.bf16 %v484_v53, %v484_v53  ;;  %631 = vst.msk [vmem:[%s1007_s14 + $0x3c] sm:$0xf] %vm615_vm0, %v771_v54 }
 0x11b   : > { %647 = vst.msk [vmem:[%s1007_s14 + $0x7c] sm:$0xf] %vm615_vm0, %v787_v55  ;;  %629 = vst.msk [vmem:[%s1007_s14 + $0x34] sm:$0xf] %vm615_vm0, %v769_v56 }
 0x11c   : > { %645 = vst.msk [vmem:[%s1007_s14 + $0x74] sm:$0xf] %vm615_vm0, %v785_v57 }
 0x11d PF: > { %s13_s12 = sadd.s32 1, %s898_s12  }
 0x11e   : > { %p10_p4 = scmp.ge.s32.totalorder %s13_s12, 4  }
 0x120   :  { %12 = sbr.rel (!%p10_p4) target bundleno = 1 (0x1), region = 62 }

// kernel: inception_resnet_a.9
= control target key start
LH: loop header
LB: loop body
LE: loop exit
PB: predicated region body
PF: predicated region fallthrough
CT: control target
= control target key end

     0   :  { %s1898_s21 = smov 0   ;;  %s2295_s0 = inlined_call_operand.vmem [shape: bf16[512,32], index: 0, kind: input, shape index: {}]   ;;  %s2296_s1 = inlined_call_operand.vmem [shape: f32[512,32], index: 1, kind: input, shape index: {}]   ;;  %s2297_s2 = inlined_call_operand.vmem [shape: f32[512,32], index: 2, kind: input, shape index: {}]   ;;  %s2298_s3 = inlined_call_operand.vmem [shape: f32[512,128], index: 3, kind: input, shape index: {}, may-alias: {3,6}]   ;;  %s2299_s4 = inlined_call_operand.vmem [shape: bf16[3,32,128], index: 4, kind: input, shape index: {}]   ;;  %s2300_s5 = inlined_call_operand.vmem [shape: f32[1,128], index: 5, kind: input, shape index: {}]   ;;  %s2301_s6 = inlined_call_operand.vmem [shape: f32[512,128], index: 6, kind: output, shape index: {}, may-alias: {3,6}]  }
   0x1 LB: > { %s1499_s22 = sadd.s32 4294967295, %s1861_s21   ;;  %p1503_p0 = scmp.ge.s32.totalorder %s1861_s21, 1  ;;  %s1861_s21 = sphi %s1898_s21, %s16_s21  }
   0x2   : > { %p246_p1 = scmp.lt.s32.totalorder %s1861_s21, 3 }
   0x4   : > { %p247_p2 = pnand %p1503_p0, %p246_p1 }
   0x5   : > { %v1833_v0 = vld [vmem:[%s2299_s4 + $0x10] sm:$0xff] (!%p247_p2)   ;;  %s1504_s25 = sshll.u32 (!%p247_p2), %s1499_s22, 5  ;;  %v1834_v1 = vld [vmem:[%s2299_s4] sm:$0xff] (!%p247_p2)   ;;  %v1835_v2 = vld [vmem:[%s2299_s4 + $0x18] sm:$0xff] (!%p247_p2)   ;;  %vm423_vm0 = vcmask (!%p247_p2), 261120  }
   0x6   : > { %250 = sbr.rel (%p247_p2) target bundleno = 332 (0x14c), region = 44  ;;  %p292_p3 = scmp.lt.s32.totalorder (!%p247_p2), %s1504_s25, 63  ;;  %1649 = vmatprep.subr.bf16.mxu1 (!%p247_p2), %v1833_v0  ;;  %1685 = vmatprep.subr.bf16.mxu0 (!%p247_p2), %v1834_v1  ;;  %v1836_v3 = vld [vmem:[%s2299_s4 + $0x8] sm:$0xff] (!%p247_p2)   ;;  %v1839_v4 = vld [vmem:[%s2299_s4 + $0x20] sm:$0xff] (!%p247_p2)  }
   0x7   : > { %1650 = vmatpush3.bf16.msra.mxu1 (!%p247_p2), %v1833_v0  ;;  %1686 = vmatpush3.bf16.msra.mxu0 (!%p247_p2), %v1834_v1  ;;  %v1844_v11 = vld [vmem:[%s2299_s4 + $0x28] sm:$0xff] (!%p247_p2)  }
   0x8   : > { %1651 = vmatprep.subr.bf16.mxu1 (!%p247_p2), %v1835_v2  ;;  %1687 = vmatprep.subr.bf16.mxu0 (!%p247_p2), %v1836_v3 }
   0xb   : > { %1652 = vmatpush3.bf16.msra.mxu1 (!%p247_p2), %v1835_v2  ;;  %1688 = vmatpush3.bf16.msra.mxu0 (!%p247_p2), %v1836_v3 }
   0xc   : > { %1757 = vmatprep.subr.bf16.mxu1 (!%p247_p2), %v1834_v1  ;;  %1721 = vmatprep.subr.bf16.mxu0 (!%p247_p2), %v1839_v4 }
   0xd   : > { %s2303_s25 = smov (!%p292_p3, %s1504_s25), 63 }
   0xe   : > { %s1921_s10 = sshll.u32 %s2303_s25, 3  ;;  %s1505_s11 = sshll.u32 %s2303_s25, 2 }
   0xf   : > { %s1927_s14 = scalar_lea.vmem %s2296_s1, %s1921_s10  ;;  %s1934_s17 = scalar_lea.vmem %s2295_s0, %s1505_s11 }
  0x10   : > { %v358_v5 = vld [vmem:[%s1927_s14] sm:$0xff]  ;;  %v359_v6 = vld [vmem:[%s1927_s14 + $0x8] sm:$0xff]  ;;  %v360_v7 = vld [vmem:[%s1927_s14 + $0x10] sm:$0xff]  ;;  %s1972_s23 = scalar_lea.vmem %s2297_s2, %s1921_s10  ;;  %s2099_s26 = scalar_lea.vmem %s2298_s3, %s1921_s10 }
  0x11   : > { %v390_v8 = vpack.c.bf16 %v359_v6, %v358_v5  ;;  %v1837_v9 = vld [vmem:[%s1934_s17] sm:$0xff]   ;;  %v361_v10 = vld [vmem:[%s1927_s14 + $0x18] sm:$0xff]  ;;  %v1838_v13 = vld [vmem:[%s1934_s17 + $0x8] sm:$0xff]   ;;  %s2184_s7 = scalar_lea.vmem %s2301_s6, %s1921_s10 }
  0x12   : > { %1689 = vmatprep.mubr.msk.bf16.mxu0 %vm423_vm0, %v1837_v9  ;;  %v391_v12 = vpack.c.bf16 %v361_v10, %v360_v7  ;;  %v362_v14 = vld [vmem:[%s1927_s14 + $0x20] sm:$0xff]  ;;  %v363_v15 = vld [vmem:[%s1927_s14 + $0x28] sm:$0xff]  ;;  %v1840_v17 = vld [vmem:[%s1934_s17 + $0x10] sm:$0xff]  }
  0x13   : > { %1653 = vmatprep.mubr.msk.bf16.mxu1 %vm423_vm0, %v390_v8  ;;  %v392_v16 = vpack.c.bf16 %v363_v15, %v362_v14  ;;  %1690 = vmatmul.mubr.msk.bf16.vlgmr.msra.gmra.mrb[0].mxu0 %vm423_vm0, %v1838_v13  ;;  %v364_v18 = vld [vmem:[%s1927_s14 + $0x30] sm:$0xff]  ;;  %v365_v19 = vld [vmem:[%s1927_s14 + $0x38] sm:$0xff]  ;;  %v366_v20 = vld [vmem:[%s1927_s14 + $0x40] sm:$0xff] }
  0x14   : > { %1654 = vmatmul.mubr.msk.bf16.vlgmr.msra.gmra.mrb[0].mxu1 %vm423_vm0, %v391_v12  ;;  %1722 = vmatpush3.bf16.msra.mxu0 %v1839_v4  ;;  %v367_v21 = vld [vmem:[%s1927_s14 + $0x48] sm:$0xff]  ;;  %v393_v22 = vpack.c.bf16 %v365_v19, %v364_v18  ;;  %v1841_v23 = vld [vmem:[%s1934_s17 + $0x18] sm:$0xff]   ;;  %v1842_v25 = vld [vmem:[%s1934_s17 + $0x20] sm:$0xff]  }
  0x15   : > { %1759 = vmatpush3.bf16.msra.mxu1 %v1834_v1  ;;  %1657 = vmatprep.mubr.msk.bf16.mxu1 %vm423_vm0, %v392_v16  ;;  %v394_v24 = vpack.c.bf16 %v367_v21, %v366_v20  ;;  %v368_v26 = vld [vmem:[%s1927_s14 + $0x50] sm:$0xff]  ;;  %v369_v27 = vld [vmem:[%s1927_s14 + $0x58] sm:$0xff]  ;;  %v370_v28 = vld [vmem:[%s1927_s14 + $0x60] sm:$0xff] }
  0x16   : > { %1693 = vmatprep.mubr.msk.bf16.mxu0 %vm423_vm0, %v1840_v17  ;;  %1723 = vmatprep.subr.bf16.mxu0 %v1844_v11  ;;  %v371_v29 = vld [vmem:[%s1927_s14 + $0x68] sm:$0xff]  ;;  %v395_v30 = vpack.c.bf16 %v369_v27, %v368_v26  ;;  %v1845_v33 = vld [vmem:[%s1934_s17 + $0x30] sm:$0xff]   ;;  %v373_v35 = vld [vmem:[%s1927_s14 + $0x78] sm:$0xff] }
  0x17   : > { %1758 = vmatprep.subr.bf16.mxu1 %v1836_v3  ;;  %v1843_v31 = vld [vmem:[%s1934_s17 + $0x28] sm:$0xff]   ;;  %v396_v32 = vpack.c.bf16 %v371_v29, %v370_v28  ;;  %v372_v34 = vld [vmem:[%s1927_s14 + $0x70] sm:$0xff]  ;;  %v374_v36 = vld [vmem:[%s1927_s14 + $0x80] sm:$0xff] }
  0x18   : > { %1724 = vmatpush3.bf16.msra.mxu0 %v1844_v11  ;;  %v375_v37 = vld [vmem:[%s1927_s14 + $0x88] sm:$0xff]  ;;  %v934_v38 = vld [vmem:[%s1972_s23] sm:$0xff]  ;;  %v397_v40 = vpack.c.bf16 %v373_v35, %v372_v34  ;;  %v1846_v41 = vld [vmem:[%s1934_s17 + $0x38] sm:$0xff]  }
  0x19   : > { %1760 = vmatpush3.bf16.msra.mxu1 %v1836_v3  ;;  %v935_v39 = vld [vmem:[%s1972_s23 + $0x8] sm:$0xff]  ;;  %v398_v42 = vpack.c.bf16 %v375_v37, %v374_v36  ;;  %v376_v44 = vld [vmem:[%s1927_s14 + $0x90] sm:$0xff]  ;;  %v377_v45 = vld [vmem:[%s1927_s14 + $0x98] sm:$0xff] }
  0x1a   : > { %v966_v43 = vpack.c.bf16 %v935_v39, %v934_v38  ;;  %v936_v46 = vld [vmem:[%s1972_s23 + $0x10] sm:$0xff]  ;;  %v937_v47 = vld [vmem:[%s1972_s23 + $0x18] sm:$0xff]  ;;  %v378_v48 = vld [vmem:[%s1927_s14 + $0xa0] sm:$0xff]  ;;  %v399_v52 = vpack.c.bf16 %v377_v45, %v376_v44 }
  0x1b   : > { %1694 = vmatmul.mubr.msk.bf16.gmra.mrb[4].mxu0 %vm423_vm0, %v1841_v23  ;;  %v379_v49 = vld [vmem:[%s1927_s14 + $0xa8] sm:$0xff]  ;;  %v938_v50 = vld [vmem:[%s1972_s23 + $0x20] sm:$0xff]  ;;  %v967_v53 = vpack.c.bf16 %v937_v47, %v936_v46  ;;  %v380_v56 = vld [vmem:[%s1927_s14 + $0xb0] sm:$0xff] }
  0x1c   : > { %1658 = vmatmul.mubr.msk.bf16.gmra.mrb[4].mxu1 %vm423_vm0, %v393_v22  ;;  %1697 = vmatprep.mubr.msk.bf16.mxu0 %vm423_vm0, %v1842_v25  ;;  %v939_v51 = vld [vmem:[%s1972_s23 + $0x28] sm:$0xff]  ;;  %v400_v54 = vpack.c.bf16 %v379_v49, %v378_v48  ;;  %v381_v57 = vld [vmem:[%s1927_s14 + $0xb8] sm:$0xff]  ;;  %v940_v58 = vld [vmem:[%s1972_s23 + $0x30] sm:$0xff] }
  0x1d   : > { %1661 = vmatprep.mubr.msk.bf16.mxu1 %vm423_vm0, %v394_v24  ;;  %v968_v55 = vpack.c.bf16 %v939_v51, %v938_v50  ;;  %v941_v59 = vld [vmem:[%s1972_s23 + $0x38] sm:$0xff]  ;;  %v382_v60 = vld [vmem:[%s1927_s14 + $0xc0] sm:$0xff]  ;;  %v383_v61 = vld [vmem:[%s1927_s14 + $0xc8] sm:$0xff]  ;;  %v401_v0 = vpack.c.bf16 %v381_v57, %v380_v56 }
  0x1e   : > { %v942_v62 = vld [vmem:[%s1972_s23 + $0x40] sm:$0xff]  ;;  %v943_v63 = vld [vmem:[%s1972_s23 + $0x48] sm:$0xff]  ;;  %v969_v1 = vpack.c.bf16 %v941_v59, %v940_v58  ;;  %v402_v2 = vpack.c.bf16 %v383_v61, %v382_v60  ;;  %v384_v4 = vld [vmem:[%s1927_s14 + $0xd0] sm:$0xff] }
  0x1f   : > { %v970_v3 = vpack.c.bf16 %v943_v63, %v942_v62  ;;  %v385_v5 = vld [vmem:[%s1927_s14 + $0xd8] sm:$0xff]  ;;  %v944_v6 = vld [vmem:[%s1972_s23 + $0x50] sm:$0xff]  ;;  %v386_v8 = vld [vmem:[%s1927_s14 + $0xe0] sm:$0xff] }
  0x20   : > { %v945_v7 = vld [vmem:[%s1972_s23 + $0x58] sm:$0xff]  ;;  %v387_v9 = vld [vmem:[%s1927_s14 + $0xe8] sm:$0xff]  ;;  %v946_v10 = vld [vmem:[%s1972_s23 + $0x60] sm:$0xff]  ;;  %v403_v12 = vpack.c.bf16 %v385_v5, %v384_v4 }
  0x21   : > { %v947_v11 = vld [vmem:[%s1972_s23 + $0x68] sm:$0xff]  ;;  %v971_v13 = vpack.c.bf16 %v945_v7, %v944_v6  ;;  %v404_v14 = vpack.c.bf16 %v387_v9, %v386_v8  ;;  %v388_v16 = vld [vmem:[%s1927_s14 + $0xf0] sm:$0xff]  ;;  %v389_v17 = vld [vmem:[%s1927_s14 + $0xf8] sm:$0xff] }
  0x22   : > { %v972_v15 = vpack.c.bf16 %v947_v11, %v946_v10  ;;  %v948_v18 = vld [vmem:[%s1972_s23 + $0x70] sm:$0xff]  ;;  %v949_v19 = vld [vmem:[%s1972_s23 + $0x78] sm:$0xff]  ;;  %v950_v20 = vld [vmem:[%s1972_s23 + $0x80] sm:$0xff]  ;;  %v405_v22 = vpack.c.bf16 %v389_v17, %v388_v16 }
  0x23   : > { %1698 = vmatmul.mubr.msk.bf16.gmra.mrb[8].mxu0 %vm423_vm0, %v1843_v31  ;;  %v951_v21 = vld [vmem:[%s1972_s23 + $0x88] sm:$0xff]  ;;  %v973_v23 = vpack.c.bf16 %v949_v19, %v948_v18  ;;  %v1847_v24 = vld [vmem:[%s1934_s17 + $0x40] sm:$0xff]   ;;  %v952_v26 = vld [vmem:[%s1972_s23 + $0x90] sm:$0xff] }
  0x24   : > { %1662 = vmatmul.mubr.msk.bf16.gmra.mrb[8].mxu1 %vm423_vm0, %v395_v30  ;;  %1701 = vmatprep.mubr.msk.bf16.mxu0 %vm423_vm0, %v1845_v33  ;;  %v974_v25 = vpack.c.bf16 %v951_v21, %v950_v20  ;;  %v953_v27 = vld [vmem:[%s1972_s23 + $0x98] sm:$0xff]  ;;  %v954_v28 = vld [vmem:[%s1972_s23 + $0xa0] sm:$0xff]  ;;  %v955_v29 = vld [vmem:[%s1972_s23 + $0xa8] sm:$0xff] }
  0x25   : > { %1665 = vmatprep.mubr.msk.bf16.mxu1 %vm423_vm0, %v396_v32  ;;  %v1848_v30 = vld [vmem:[%s1934_s17 + $0x48] sm:$0xff]   ;;  %v975_v31 = vpack.c.bf16 %v953_v27, %v952_v26  ;;  %v1849_v32 = vld [vmem:[%s1934_s17 + $0x50] sm:$0xff]   ;;  %v976_v33 = vpack.c.bf16 %v955_v29, %v954_v28  ;;  %v957_v35 = vld [vmem:[%s1972_s23 + $0xb8] sm:$0xff] }
  0x26   : > { %v956_v34 = vld [vmem:[%s1972_s23 + $0xb0] sm:$0xff]  ;;  %v958_v36 = vld [vmem:[%s1972_s23 + $0xc0] sm:$0xff]  ;;  %v959_v37 = vld [vmem:[%s1972_s23 + $0xc8] sm:$0xff] }
  0x27   : > { %v1850_v38 = vld [vmem:[%s1934_s17 + $0x58] sm:$0xff]   ;;  %v977_v39 = vpack.c.bf16 %v957_v35, %v956_v34  ;;  %v962_v44 = vld [vmem:[%s1972_s23 + $0xe0] sm:$0xff]  ;;  %v963_v45 = vld [vmem:[%s1972_s23 + $0xe8] sm:$0xff] }
  0x28   : > { %v1852_v46 = vld [vmem:[%s1934_s17 + $0x68] sm:$0xff]   ;;  %v1853_v48 = vld [vmem:[%s1934_s17 + $0x70] sm:$0xff]   ;;  %v980_v49 = vpack.c.bf16 %v963_v45, %v962_v44  ;;  %v965_v51 = vld [vmem:[%s1972_s23 + $0xf8] sm:$0xff] }
  0x29   : > { %v964_v50 = vld [vmem:[%s1972_s23 + $0xf0] sm:$0xff]  ;;  %v2104_v7 = vld [vmem:[%s2300_s5] ss:$0 sm:$0xff]  ;;  %v1282_v16 = vld [vmem:[%s2099_s26 + $0x18] sm:$0xff] }
  0x2a   : > { %v1281_v10 = vld [vmem:[%s2099_s26 + $0x10] sm:$0xff]  ;;  %v1280_v18 = vld [vmem:[%s2099_s26 + $0x8] sm:$0xff]  ;;  %v2120_v26 = vld [vmem:[%s2099_s26 + $0x40] sm:$0xff] }
  0x2b   : > { %1702 = vmatmul.mubr.msk.bf16.gmra.mrb[12].mxu0 %vm423_vm0, %v1846_v41  ;;  %v978_v41 = vpack.c.bf16 %v959_v37, %v958_v36  ;;  %v1285_v21 = vld [vmem:[%s2099_s26 + $0x30] sm:$0xff]  ;;  %v2123_v27 = vld [vmem:[%s2099_s26 + $0x58] sm:$0xff]  ;;  %v2126_v28 = vld [vmem:[%s2099_s26 + $0x48] sm:$0xff] }
  0x2c   : > { %1666 = vmatmul.mubr.msk.bf16.gmra.mrb[12].mxu1 %vm423_vm0, %v397_v40  ;;  %1725 = vmatprep.mubr.msk.bf16.mxu0 %vm423_vm0, %v966_v43  ;;  %v1851_v40 = vld [vmem:[%s1934_s17 + $0x60] sm:$0xff]   ;;  %v961_v43 = vld [vmem:[%s1972_s23 + $0xd8] sm:$0xff]  ;;  %v2129_v29 = vld [vmem:[%s2099_s26 + $0x70] sm:$0xff] }
  0x2d   : > { %1669 = vmatprep.mubr.msk.bf16.mxu1 %vm423_vm0, %v398_v42  ;;  %v960_v42 = vld [vmem:[%s1972_s23 + $0xd0] sm:$0xff]  ;;  %v2144_v34 = vld [vmem:[%s2099_s26 + $0x80] sm:$0xff]  ;;  %v2147_v35 = vld [vmem:[%s2099_s26 + $0x98] sm:$0xff] }
  0x2e   : > { %v979_v47 = vpack.c.bf16 %v961_v43, %v960_v42  ;;  %v2150_v36 = vld [vmem:[%s2099_s26 + $0x88] sm:$0xff]  ;;  %v2153_v37 = vld [vmem:[%s2099_s26 + $0xb0] sm:$0xff]  ;;  %v2168_v42 = vld [vmem:[%s2099_s26 + $0xc0] sm:$0xff] }
  0x2f   : > { %v2172_v45 = vld [vmem:[%s2099_s26 + $0xd8] sm:$0xff] }
  0x33   : > { %1726 = vmatmul.mubr.msk.bf16.vlgmr.msra.gmra.mrb[0].mxu0 %vm423_vm0, %v967_v53  ;;  %v981_v53 = vpack.c.bf16 %v965_v51, %v964_v50  ;;  %v2188_v50 = vld [vmem:[%s2099_s26 + $0xe0] sm:$0xff]  ;;  %v2191_v51 = vld [vmem:[%s2099_s26 + $0xf8] sm:$0xff] }
  0x34   : > { %1670 = vmatmul.mubr.msk.bf16.gmra.mrb[16].mxu1 %vm423_vm0, %v399_v52  ;;  %1729 = vmatprep.mubr.msk.bf16.mxu0 %vm423_vm0, %v968_v55  ;;  %v1854_v52 = vld [vmem:[%s1934_s17 + $0x78] sm:$0xff]  }
  0x35   : > { %1673 = vmatprep.mubr.msk.bf16.mxu1 %vm423_vm0, %v400_v54 }
  0x3b   : > { %1730 = vmatmul.mubr.msk.bf16.gmra.mrb[4].mxu0 %vm423_vm0, %v969_v1 }
  0x3c   : > { %1674 = vmatmul.mubr.msk.bf16.gmra.mrb[20].mxu1 %vm423_vm0, %v401_v0  ;;  %1733 = vmatprep.mubr.msk.bf16.mxu0 %vm423_vm0, %v970_v3 }
  0x3d   : > { %1677 = vmatprep.mubr.msk.bf16.mxu1 %vm423_vm0, %v402_v2 }
  0x43   : > { %1734 = vmatmul.mubr.msk.bf16.gmra.mrb[8].mxu0 %vm423_vm0, %v971_v13 }
  0x44   : > { %1678 = vmatmul.mubr.msk.bf16.gmra.mrb[24].mxu1 %vm423_vm0, %v403_v12  ;;  %1737 = vmatprep.mubr.msk.bf16.mxu0 %vm423_vm0, %v972_v15 }
  0x45   : > { %1681 = vmatprep.mubr.msk.bf16.mxu1 %vm423_vm0, %v404_v14  ;;  %v1279_v14 = vld [vmem:[%s2099_s26] sm:$0xff] }
  0x4b   : > { %1738 = vmatmul.mubr.msk.bf16.gmra.mrb[12].mxu0 %vm423_vm0, %v973_v23  ;;  %v1286_v23 = vld [vmem:[%s2099_s26 + $0x38] sm:$0xff] }
  0x4c   : > { %1682 = vmatmul.mubr.msk.bf16.gmra.mrb[28].mxu1 %vm423_vm0, %v405_v22  ;;  %1741 = vmatprep.mubr.msk.bf16.mxu0 %vm423_vm0, %v974_v25  ;;  %v1283_v22 = vld [vmem:[%s2099_s26 + $0x20] sm:$0xff]  ;;  %v2117_v25 = vld [vmem:[%s2099_s26 + $0x50] sm:$0xff] }
  0x4d   : > { %1705 = vmatprep.mubr.msk.bf16.mxu1 %vm423_vm0, %v1847_v24  ;;  %v1284_v24 = vld [vmem:[%s2099_s26 + $0x28] sm:$0xff] }
  0x53   : > { %1742 = vmatmul.mubr.msk.bf16.gmra.mrb[16].mxu0 %vm423_vm0, %v975_v31  ;;  %v2135_v31 = vld [vmem:[%s2099_s26 + $0x78] sm:$0xff] }
  0x54   : > { %1706 = vmatmul.mubr.msk.bf16.vlgmr.msra.gmra.mrb[16].mxu1 %vm423_vm0, %v1848_v30  ;;  %1745 = vmatprep.mubr.msk.bf16.mxu0 %vm423_vm0, %v976_v33  ;;  %v2132_v30 = vld [vmem:[%s2099_s26 + $0x60] sm:$0xff]  ;;  %v2141_v33 = vld [vmem:[%s2099_s26 + $0x90] sm:$0xff] }
  0x55   : > { %1709 = vmatprep.mubr.msk.bf16.mxu1 %vm423_vm0, %v1849_v32  ;;  %v2138_v32 = vld [vmem:[%s2099_s26 + $0x68] sm:$0xff] }
  0x5b   : > { %1746 = vmatmul.mubr.msk.bf16.gmra.mrb[20].mxu0 %vm423_vm0, %v977_v39  ;;  %v2159_v39 = vld [vmem:[%s2099_s26 + $0xb8] sm:$0xff] }
  0x5c   : > { %1710 = vmatmul.mubr.msk.bf16.gmra.mrb[20].mxu1 %vm423_vm0, %v1850_v38  ;;  %1749 = vmatprep.mubr.msk.bf16.mxu0 %vm423_vm0, %v978_v41  ;;  %v2156_v38 = vld [vmem:[%s2099_s26 + $0xa0] sm:$0xff]  ;;  %v2165_v41 = vld [vmem:[%s2099_s26 + $0xd0] sm:$0xff] }
  0x5d   : > { %1713 = vmatprep.mubr.msk.bf16.mxu1 %vm423_vm0, %v1851_v40  ;;  %v2162_v40 = vld [vmem:[%s2099_s26 + $0xa8] sm:$0xff] }
  0x63   : > { %1750 = vmatmul.mubr.msk.bf16.gmra.mrb[24].mxu0 %vm423_vm0, %v979_v47  ;;  %v2178_v47 = vld [vmem:[%s2099_s26 + $0xf0] sm:$0xff] }
  0x64   : > { %1714 = vmatmul.mubr.msk.bf16.gmra.mrb[24].mxu1 %vm423_vm0, %v1852_v46  ;;  %1753 = vmatprep.mubr.msk.bf16.mxu0 %vm423_vm0, %v980_v49  ;;  %v2175_v46 = vld [vmem:[%s2099_s26 + $0xc8] sm:$0xff] }
  0x65   : > { %1717 = vmatprep.mubr.msk.bf16.mxu1 %vm423_vm0, %v1853_v48 }
  0x6b   : > { %1754 = vmatmul.mubr.msk.bf16.gmra.mrb[28].mxu0 %vm423_vm0, %v981_v53 }
  0x6c   : > { %1718 = vmatmul.mubr.msk.bf16.gmra.mrb[28].mxu1 %vm423_vm0, %v1854_v52  ;;  %v2194_v52 = vld [vmem:[%s2099_s26 + $0xe8] sm:$0xff] }
  0xe7   : > { %v1655_v54 = vpop.f32.mrb[0].mxu1 }
  0xe8   : > { %v506_v55 = vpop.f32.mrb[1].mxu1 }
  0xe9   : > { %v1656_v56 = vpop.f32.mrb[2].mxu1 }
  0xea   : > { %v509_v57 = vpop.f32.mrb[3].mxu1 }
  0xef   : > { %v2071_v58 = vpop.f32.mrb[4].mxu1 }
  0xf0   : > { %v2073_v59 = vpop.f32.mrb[5].mxu1 }
  0xf1   : > { %v2075_v60 = vpop.f32.mrb[6].mxu1 }
  0xf2   : > { %v2077_v61 = vpop.f32.mrb[7].mxu1 }
  0xf7   : > { %v2079_v62 = vpop.f32.mrb[8].mxu1 }
  0xf8   : > { %v2081_v63 = vpop.f32.mrb[9].mxu1 }
  0xf9   : > { %v2083_v0 = vpop.f32.mrb[10].mxu1 }
  0xfa   : > { %v2085_v1 = vpop.f32.mrb[11].mxu1 }
  0xff   : > { %v2087_v2 = vpop.f32.mrb[12].mxu1 }
 0x100   : > { %v2089_v3 = vpop.f32.mrb[13].mxu1 }
 0x101   : > { %v2091_v4 = vpop.f32.mrb[14].mxu1 }
 0x102   : > { %v2093_v5 = vpop.f32.mrb[15].mxu1 }
 0x106   : > { %v1727_v6 = vpop.f32.mrb[0].mxu0 }
 0x107   : > { %v1761_v8 = vadd.f32 %v1727_v6, %v1655_v54  ;;  %v1081_v9 = vpop.f32.mrb[1].mxu0 }
 0x108   : > { %v1762_v11 = vadd.f32 %v1081_v9, %v506_v55  ;;  %v1728_v12 = vpop.f32.mrb[2].mxu0 }
 0x109   : > { %v1249_v13 = vadd.f32 %v1761_v8, %v2104_v7  ;;  %v1763_v15 = vadd.f32 %v1728_v12, %v1656_v56  ;;  %v1084_v17 = vpop.f32.mrb[3].mxu0 }
 0x10a   : > { %v1247_v19 = vadd.f32 %v1762_v11, %v2104_v7  ;;  %v1764_v20 = vadd.f32 %v1084_v17, %v509_v57 }
 0x10b   : > { %v1313_v43 = vadd.f32 %v1281_v10, %v1249_v13  ;;  %v1250_v44 = vadd.f32 %v1763_v15, %v2104_v7 }
 0x10c   : > { %v1311_v48 = vadd.f32 %v1279_v14, %v1247_v19  ;;  %v1248_v49 = vadd.f32 %v1764_v20, %v2104_v7 }
 0x10d   : > { %v1345_v53 = vmax.f32 %v1313_v43, 0.0  ;;  %v1314_v54 = vadd.f32 %v1282_v16, %v1250_v44 }
 0x10e   : > { %v1343_v55 = vmax.f32 %v1311_v48, 0.0  ;;  %v1312_v56 = vadd.f32 %v1280_v18, %v1248_v49  ;;  %v1731_v57 = vpop.f32.mrb[4].mxu0 }
 0x10f   : > { %v1346_v6 = vmax.f32 %v1314_v54, 0.0  ;;  %v1765_v8 = vadd.f32 %v1731_v57, %v2071_v58  ;;  %v1097_v9 = vpop.f32.mrb[5].mxu0  ;;  %1377 = vst [vmem:[%s2184_s7 + $0x10] sm:$0xff] %v1345_v53 }
 0x110   : > { %v1344_v10 = vmax.f32 %v1312_v56, 0.0  ;;  %v1766_v11 = vadd.f32 %v1097_v9, %v2073_v59  ;;  %v1732_v12 = vpop.f32.mrb[6].mxu0  ;;  %1375 = vst [vmem:[%s2184_s7] sm:$0xff] %v1343_v55 }
 0x111   : > { %v1253_v13 = vadd.f32 %v1765_v8, %v2104_v7  ;;  %v1767_v14 = vadd.f32 %v1732_v12, %v2075_v60  ;;  %v1100_v15 = vpop.f32.mrb[7].mxu0  ;;  %1378 = vst [vmem:[%s2184_s7 + $0x18] sm:$0xff] %v1346_v6 }
 0x112   : > { %v1251_v16 = vadd.f32 %v1766_v11, %v2104_v7  ;;  %v1768_v17 = vadd.f32 %v1100_v15, %v2077_v61  ;;  %1376 = vst [vmem:[%s2184_s7 + $0x8] sm:$0xff] %v1344_v10 }
 0x113   : > { %v1317_v58 = vadd.f32 %v1285_v21, %v1253_v13  ;;  %v1254_v18 = vadd.f32 %v1767_v14, %v2104_v7 }
 0x114   : > { %v1315_v19 = vadd.f32 %v1283_v22, %v1251_v16  ;;  %v1252_v59 = vadd.f32 %v1768_v17, %v2104_v7 }
 0x115   : > { %v1349_v20 = vmax.f32 %v1317_v58, 0.0  ;;  %v1318_v43 = vadd.f32 %v1286_v23, %v1254_v18 }
 0x116   : > { %v1347_v44 = vmax.f32 %v1315_v19, 0.0  ;;  %v1316_v60 = vadd.f32 %v1284_v24, %v1252_v59  ;;  %v1735_v48 = vpop.f32.mrb[8].mxu0 }
 0x117   : > { %v1350_v49 = vmax.f32 %v1318_v43, 0.0  ;;  %v1769_v53 = vadd.f32 %v1735_v48, %v2079_v62  ;;  %v1113_v54 = vpop.f32.mrb[9].mxu0  ;;  %1381 = vst [vmem:[%s2184_s7 + $0x30] sm:$0xff] %v1349_v20 }
 0x118   : > { %v1348_v61 = vmax.f32 %v1316_v60, 0.0  ;;  %v1770_v21 = vadd.f32 %v1113_v54, %v2081_v63  ;;  %v1736_v55 = vpop.f32.mrb[10].mxu0  ;;  %1379 = vst [vmem:[%s2184_s7 + $0x20] sm:$0xff] %v1347_v44 }
 0x119   : > { %v1257_v22 = vadd.f32 %v1769_v53, %v2104_v7  ;;  %v1771_v56 = vadd.f32 %v1736_v55, %v2083_v0  ;;  %v1116_v57 = vpop.f32.mrb[11].mxu0  ;;  %1382 = vst [vmem:[%s2184_s7 + $0x38] sm:$0xff] %v1350_v49 }
 0x11a   : > { %v1255_v23 = vadd.f32 %v1770_v21, %v2104_v7  ;;  %v1772_v24 = vadd.f32 %v1116_v57, %v2085_v1  ;;  %1380 = vst [vmem:[%s2184_s7 + $0x28] sm:$0xff] %v1348_v61 }
 0x11b   : > { %v1321_v62 = vadd.f32 %v2117_v25, %v1257_v22  ;;  %v1258_v6 = vadd.f32 %v1771_v56, %v2104_v7 }
 0x11c   : > { %v1319_v63 = vadd.f32 %v2120_v26, %v1255_v23  ;;  %v1256_v8 = vadd.f32 %v1772_v24, %v2104_v7 }
 0x11d   : > { %v1353_v9 = vmax.f32 %v1321_v62, 0.0  ;;  %v1322_v0 = vadd.f32 %v2123_v27, %v1258_v6 }
 0x11e   : > { %v1351_v10 = vmax.f32 %v1319_v63, 0.0  ;;  %v1320_v11 = vadd.f32 %v2126_v28, %v1256_v8  ;;  %v1739_v12 = vpop.f32.mrb[12].mxu0 }
 0x11f   : > { %v1354_v1 = vmax.f32 %v1322_v0, 0.0  ;;  %v1773_v13 = vadd.f32 %v1739_v12, %v2087_v2  ;;  %v1129_v25 = vpop.f32.mrb[13].mxu0  ;;  %1385 = vst [vmem:[%s2184_s7 + $0x50] sm:$0xff] %v1353_v9 }
 0x120   : > { %v1352_v14 = vmax.f32 %v1320_v11, 0.0  ;;  %v1774_v15 = vadd.f32 %v1129_v25, %v2089_v3  ;;  %v1740_v26 = vpop.f32.mrb[14].mxu0  ;;  %1383 = vst [vmem:[%s2184_s7 + $0x40] sm:$0xff] %v1351_v10 }
 0x121   : > { %v1261_v16 = vadd.f32 %v1773_v13, %v2104_v7  ;;  %v1775_v17 = vadd.f32 %v1740_v26, %v2091_v4  ;;  %v1132_v27 = vpop.f32.mrb[15].mxu0  ;;  %1386 = vst [vmem:[%s2184_s7 + $0x58] sm:$0xff] %v1354_v1 }
 0x122   : > { %v1259_v28 = vadd.f32 %v1774_v15, %v2104_v7  ;;  %v1776_v58 = vadd.f32 %v1132_v27, %v2093_v5  ;;  %1384 = vst [vmem:[%s2184_s7 + $0x48] sm:$0xff] %v1352_v14 }
 0x123   : > { %v1325_v2 = vadd.f32 %v2129_v29, %v1261_v16  ;;  %v1262_v18 = vadd.f32 %v1775_v17, %v2104_v7 }
 0x124   : > { %v1323_v3 = vadd.f32 %v2132_v30, %v1259_v28  ;;  %v1260_v19 = vadd.f32 %v1776_v58, %v2104_v7 }
 0x125   : > { %v1357_v59 = vmax.f32 %v1325_v2, 0.0  ;;  %v1326_v4 = vadd.f32 %v2135_v31, %v1262_v18 }
 0x126   : > { %v1355_v20 = vmax.f32 %v1323_v3, 0.0  ;;  %v1324_v43 = vadd.f32 %v2138_v32, %v1260_v19  ;;  %v1743_v5 = vpop.f32.mrb[16].mxu0 }
 0x127   : > { %v1707_v44 = vpop.f32.mrb[16].mxu1  ;;  %v1358_v60 = vmax.f32 %v1326_v4, 0.0  ;;  %v1145_v49 = vpop.f32.mrb[17].mxu0  ;;  %1389 = vst [vmem:[%s2184_s7 + $0x70] sm:$0xff] %v1357_v59 }
 0x128   : > { %v1777_v48 = vadd.f32 %v1743_v5, %v1707_v44  ;;  %v871_v29 = vpop.f32.mrb[17].mxu1  ;;  %v1356_v53 = vmax.f32 %v1324_v43, 0.0  ;;  %v1744_v61 = vpop.f32.mrb[18].mxu0  ;;  %1387 = vst [vmem:[%s2184_s7 + $0x60] sm:$0xff] %v1355_v20 }
 0x129   : > { %v1778_v30 = vadd.f32 %v1145_v49, %v871_v29  ;;  %v1708_v54 = vpop.f32.mrb[18].mxu1  ;;  %v1148_v22 = vpop.f32.mrb[19].mxu0  ;;  %1390 = vst [vmem:[%s2184_s7 + $0x78] sm:$0xff] %v1358_v60 }
 0x12a   : > { %v1265_v21 = vadd.f32 %v1777_v48, %v2104_v7  ;;  %v1779_v31 = vadd.f32 %v1744_v61, %v1708_v54  ;;  %v874_v55 = vpop.f32.mrb[19].mxu1  ;;  %1388 = vst [vmem:[%s2184_s7 + $0x68] sm:$0xff] %v1356_v53 }
 0x12b   : > { %v1263_v32 = vadd.f32 %v1778_v30, %v2104_v7  ;;  %v1780_v56 = vadd.f32 %v1148_v22, %v874_v55 }
 0x12c   : > { %v1329_v57 = vadd.f32 %v2141_v33, %v1265_v21  ;;  %v1266_v23 = vadd.f32 %v1779_v31, %v2104_v7 }
 0x12d   : > { %v1327_v24 = vadd.f32 %v2144_v34, %v1263_v32  ;;  %v1264_v62 = vadd.f32 %v1780_v56, %v2104_v7 }
 0x12e   : > { %v1361_v6 = vmax.f32 %v1329_v57, 0.0  ;;  %v1330_v63 = vadd.f32 %v2147_v35, %v1266_v23  ;;  %v1747_v10 = vpop.f32.mrb[20].mxu0 }
 0x12f   : > { %v1359_v8 = vmax.f32 %v1327_v24, 0.0  ;;  %v1328_v9 = vadd.f32 %v2150_v36, %v1264_v62  ;;  %v1711_v0 = vpop.f32.mrb[20].mxu1  ;;  %v1161_v1 = vpop.f32.mrb[21].mxu0 }
 0x130   : > { %v1362_v11 = vmax.f32 %v1330_v63, 0.0  ;;  %v1781_v12 = vadd.f32 %v1747_v10, %v1711_v0  ;;  %v887_v33 = vpop.f32.mrb[21].mxu1  ;;  %1393 = vst [vmem:[%s2184_s7 + $0x90] sm:$0xff] %v1361_v6  ;;  %v1748_v14 = vpop.f32.mrb[22].mxu0 }
 0x131   : > { %v1360_v13 = vmax.f32 %v1328_v9, 0.0  ;;  %v1782_v34 = vadd.f32 %v1161_v1, %v887_v33  ;;  %v1712_v25 = vpop.f32.mrb[22].mxu1  ;;  %1391 = vst [vmem:[%s2184_s7 + $0x80] sm:$0xff] %v1359_v8  ;;  %v1164_v16 = vpop.f32.mrb[23].mxu0 }
 0x132   : > { %v1269_v15 = vadd.f32 %v1781_v12, %v2104_v7  ;;  %v1783_v35 = vadd.f32 %v1748_v14, %v1712_v25  ;;  %v890_v26 = vpop.f32.mrb[23].mxu1  ;;  %1394 = vst [vmem:[%s2184_s7 + $0x98] sm:$0xff] %v1362_v11 }
 0x133   : > { %v1267_v36 = vadd.f32 %v1782_v34, %v2104_v7  ;;  %v1784_v17 = vadd.f32 %v1164_v16, %v890_v26  ;;  %1392 = vst [vmem:[%s2184_s7 + $0x88] sm:$0xff] %v1360_v13 }
 0x134   : > { %v1333_v27 = vadd.f32 %v2153_v37, %v1269_v15  ;;  %v1270_v28 = vadd.f32 %v1783_v35, %v2104_v7 }
 0x135   : > { %v1331_v58 = vadd.f32 %v2156_v38, %v1267_v36  ;;  %v1268_v2 = vadd.f32 %v1784_v17, %v2104_v7 }
 0x136   : > { %v1365_v18 = vmax.f32 %v1333_v27, 0.0  ;;  %v1334_v3 = vadd.f32 %v2159_v39, %v1270_v28  ;;  %v1751_v20 = vpop.f32.mrb[24].mxu0 }
 0x137   : > { %v1363_v19 = vmax.f32 %v1331_v58, 0.0  ;;  %v1332_v59 = vadd.f32 %v2162_v40, %v1268_v2  ;;  %v1715_v4 = vpop.f32.mrb[24].mxu1  ;;  %v1177_v5 = vpop.f32.mrb[25].mxu0 }
 0x138   : > { %v1366_v43 = vmax.f32 %v1334_v3, 0.0  ;;  %v1785_v44 = vadd.f32 %v1751_v20, %v1715_v4  ;;  %v903_v37 = vpop.f32.mrb[25].mxu1  ;;  %1397 = vst [vmem:[%s2184_s7 + $0xb0] sm:$0xff] %v1365_v18  ;;  %v1752_v29 = vpop.f32.mrb[26].mxu0 }
 0x139   : > { %v1364_v60 = vmax.f32 %v1332_v59, 0.0  ;;  %v1786_v38 = vadd.f32 %v1177_v5, %v903_v37  ;;  %v1716_v48 = vpop.f32.mrb[26].mxu1  ;;  %1395 = vst [vmem:[%s2184_s7 + $0xa0] sm:$0xff] %v1363_v19  ;;  %v1180_v30 = vpop.f32.mrb[27].mxu0 }
 0x13a   : > { %v1273_v49 = vadd.f32 %v1785_v44, %v2104_v7  ;;  %v1787_v39 = vadd.f32 %v1752_v29, %v1716_v48  ;;  %v906_v53 = vpop.f32.mrb[27].mxu1  ;;  %1398 = vst [vmem:[%s2184_s7 + $0xb8] sm:$0xff] %v1366_v43 }
 0x13b   : > { %v1271_v40 = vadd.f32 %v1786_v38, %v2104_v7  ;;  %v1788_v54 = vadd.f32 %v1180_v30, %v906_v53  ;;  %1396 = vst [vmem:[%s2184_s7 + $0xa8] sm:$0xff] %v1364_v60 }
 0x13c   : > { %v1337_v61 = vadd.f32 %v2165_v41, %v1273_v49  ;;  %v1274_v21 = vadd.f32 %v1787_v39, %v2104_v7 }
 0x13d   : > { %v1335_v31 = vadd.f32 %v2168_v42, %v1271_v40  ;;  %v1272_v55 = vadd.f32 %v1788_v54, %v2104_v7 }
 0x13e   : > { %v1369_v22 = vmax.f32 %v1337_v61, 0.0  ;;  %v1338_v32 = vadd.f32 %v2172_v45, %v1274_v21  ;;  %v1755_v24 = vpop.f32.mrb[28].mxu0 }
 0x13f   : > { %v1367_v56 = vmax.f32 %v1335_v31, 0.0  ;;  %v1336_v57 = vadd.f32 %v2175_v46, %v1272_v55  ;;  %v1719_v23 = vpop.f32.mrb[28].mxu1  ;;  %v1193_v63 = vpop.f32.mrb[29].mxu0 }
 0x140   : > { %v1370_v62 = vmax.f32 %v1338_v32, 0.0  ;;  %v1789_v6 = vadd.f32 %v1755_v24, %v1719_v23  ;;  %v919_v41 = vpop.f32.mrb[29].mxu1  ;;  %1401 = vst [vmem:[%s2184_s7 + $0xd0] sm:$0xff] %v1369_v22  ;;  %v1756_v0 = vpop.f32.mrb[30].mxu0 }
 0x141   : > { %v1368_v8 = vmax.f32 %v1336_v57, 0.0  ;;  %v1790_v42 = vadd.f32 %v1193_v63, %v919_v41  ;;  %v1720_v9 = vpop.f32.mrb[30].mxu1  ;;  %1399 = vst [vmem:[%s2184_s7 + $0xc0] sm:$0xff] %v1367_v56  ;;  %v1196_v46 = vpop.f32.mrb[31].mxu0 }
 0x142   : > { %v1277_v10 = vadd.f32 %v1789_v6, %v2104_v7  ;;  %v1791_v45 = vadd.f32 %v1756_v0, %v1720_v9  ;;  %v922_v11 = vpop.f32.mrb[31].mxu1  ;;  %1402 = vst [vmem:[%s2184_s7 + $0xd8] sm:$0xff] %v1370_v62 }
 0x143   : > { %v1275_v12 = vadd.f32 %v1790_v42, %v2104_v7  ;;  %v1792_v33 = vadd.f32 %v1196_v46, %v922_v11  ;;  %1400 = vst [vmem:[%s2184_s7 + $0xc8] sm:$0xff] %v1368_v8 }
 0x144   : > { %v1341_v1 = vadd.f32 %v2178_v47, %v1277_v10  ;;  %v1278_v13 = vadd.f32 %v1791_v45, %v2104_v7 }
 0x145   : > { %v1339_v34 = vadd.f32 %v2188_v50, %v1275_v12  ;;  %v1276_v25 = vadd.f32 %v1792_v33, %v2104_v7 }
 0x146   : > { %v1373_v14 = vmax.f32 %v1341_v1, 0.0  ;;  %v1342_v15 = vadd.f32 %v2191_v51, %v1278_v13 }
 0x147   : > { %v1371_v35 = vmax.f32 %v1339_v34, 0.0  ;;  %v1340_v26 = vadd.f32 %v2194_v52, %v1276_v25 }
 0x148   : > { %v1374_v16 = vmax.f32 %v1342_v15, 0.0  ;;  %1405 = vst [vmem:[%s2184_s7 + $0xf0] sm:$0xff] %v1373_v14 }
 0x149   : > { %v1372_v36 = vmax.f32 %v1340_v26, 0.0  ;;  %1403 = vst [vmem:[%s2184_s7 + $0xe0] sm:$0xff] %v1371_v35 }
 0x14a   : > { %1406 = vst [vmem:[%s2184_s7 + $0xf8] sm:$0xff] %v1374_v16 }
 0x14b   : > { %1404 = vst [vmem:[%s2184_s7 + $0xe8] sm:$0xff] %v1372_v36 }
 0x14c PF: > { %s16_s21 = sadd.s32 1, %s1861_s21  }
 0x14d   : > { %p13_p4 = scmp.ge.s32.totalorder %s16_s21, 4  }
 0x14f   :  { %15 = sbr.rel (!%p13_p4) target bundleno = 1 (0x1), region = 85 }

// kernel: inception_resnet_a.6
= control target key start
LH: loop header
LB: loop body
LE: loop exit
PB: predicated region body
PF: predicated region fallthrough
CT: control target
= control target key end

     0   :  { %s3741_s12 = smov 0   ;;  %s4707_s0 = inlined_call_operand.vmem [shape: f32[2,18,18,32], index: 0, kind: input, shape index: {}]   ;;  %s4708_s1 = inlined_call_operand.vmem [shape: bf16[9,32,32], index: 1, kind: input, shape index: {}]   ;;  %s4709_s2 = inlined_call_operand.vmem [shape: f32[1,32], index: 2, kind: input, shape index: {}]   ;;  %s4710_s3 = inlined_call_operand.vmem [shape: f32[2,16,16,32], index: 3, kind: output, shape index: {}]  }
   0x1 LB: > { %s2734_s13 = sadd.s32 4294967295, %s3719_s12   ;;  %p2738_p0 = scmp.ge.s32.totalorder %s3719_s12, 1  ;;  %s3719_s12 = sphi %s3741_s12, %s13_s12  }
   0x2   : > { %p137_p1 = scmp.lt.s32.totalorder %s3719_s12, 3 }
   0x4   : > { %p138_p2 = pnand %p2738_p0, %p137_p1 }
   0x6   : > { %141 = sbr.rel (%p138_p2) target bundleno = 531 (0x213), region = 32 }
   0xd   : > { %v3695_v0 = vld [vmem:[%s4708_s1 + $0x10] sm:$0xff]   ;;  %p161_p3 = scmp.lt.s32.totalorder %s2734_s13, 1  ;;  %v3755_v1 = vld [vmem:[%s4708_s1 + $0x40] sm:$0xff]   ;;  %v3697_v2 = vld [vmem:[%s4708_s1 + $0x18] sm:$0xff]   ;;  %vm294_vm0 = vcmask 1046528   ;;  %vm440_vm1 = vcmask 261120  }
   0xe   : > { %4738 = vst [vmem:[#allocation2_spill] sm:$0xff] %v3755_v1  ;;  %3102 = vmatprep.subr.bf16.mxu1 %v3695_v0  ;;  %3246 = vmatprep.subr.bf16.mxu0 %v3755_v1  ;;  %v3766_v3 = vld [vmem:[%s4708_s1 + $0x48] sm:$0xff]   ;;  %v3699_v4 = vld [vmem:[%s4708_s1] sm:$0xff]   ;;  %v3777_v5 = vld [vmem:[%s4708_s1 + $0x50] sm:$0xff]   ;;  %vm871_vm2 = vcmask 1045504  }
   0xf   : > { %s4773_s13 = smov (!%p161_p3, %s2734_s13), 1  ;;  %3103 = vmatpush3.bf16.msra.mxu1 %v3695_v0  ;;  %4739 = vst [vmem:[#allocation3_spill] sm:$0xff] %v3766_v3  ;;  %3247 = vmatpush3.bf16.msra.mxu0 %v3755_v1  ;;  %v3701_v51 = vld [vmem:[%s4708_s1 + $0x58] sm:$0xff]   ;;  %v3702_v55 = vld [vmem:[%s4708_s1 + $0x8] sm:$0xff]   ;;  %v3906_v0 = vld [vmem:[%s4708_s1 + $0x60] sm:$0xff]  }
  0x10   : > { %3104 = vmatprep.subr.bf16.mxu1 %v3697_v2  ;;  %s3686_s22 = smul.u32 432, %s4773_s13  ;;  %3248 = vmatprep.subr.bf16.mxu0 %v3766_v3  ;;  %s2939_s4 = sshll.u32 %s4773_s13, 8 }
  0x11   : > { %s4603_s7 = scalar_lea.vmem %s4710_s3, %s2939_s4 }
  0x12   : > { %s3782_s29 = scalar_lea.vmem %s4707_s0, %s3686_s22 }
  0x13   : > { %3105 = vmatpush3.bf16.msra.mxu1 %v3697_v2  ;;  %v3785_v6 = vld [vmem:[%s3782_s29] sm:$0xff]  ;;  %v3788_v7 = vld [vmem:[%s3782_s29 + $0x8] sm:$0xff]  ;;  %v3791_v8 = vld [vmem:[%s3782_s29 + $0x10] sm:$0x3]  ;;  %3249 = vmatpush3.bf16.msra.mxu0 %v3766_v3 }
  0x14   : > { %v295_v9 = vrot.slane %v3785_v6, 1  ;;  %v296_v10 = vrot.slane %v3788_v7, 1  ;;  %v298_v11 = vrot.slane %v3791_v8, 1  ;;  %3138 = vmatprep.subr.bf16.mxu1 %v3699_v4  ;;  %v3798_v12 = vld [vmem:[%s3782_s29 + $0x18] sm:$0xff]  ;;  %v3801_v13 = vld [vmem:[%s3782_s29 + $0x20] sm:$0xff]  ;;  %3282 = vmatprep.subr.bf16.mxu0 %v3777_v5  ;;  %v3813_v17 = vld [vmem:[%s3782_s29 + $0x30] sm:$0xff] }
  0x15   : > { %v3804_v14 = vld [vmem:[%s3782_s29 + $0x28] sm:$0x3]  ;;  %v3808_v15 = vpack.c.bf16 %v3801_v13, %v3798_v12  ;;  %v300_v16 = vrot.slane %v3798_v12, 1  ;;  %v301_v20 = vrot.slane %v3801_v13, 1  ;;  %v3820_v22 = vld [vmem:[%s3782_s29 + $0x38] sm:$0xff]  ;;  %v3829_v26 = vld [vmem:[%s3782_s29 + $0x50] sm:$0xff] }
  0x16   : > { %v297_v18 = vsel %vm294_vm0, %v295_v9, %v296_v10  ;;  %v299_v19 = vsel %vm294_vm0, %v296_v10, %v298_v11  ;;  %v303_v21 = vrot.slane %v3804_v14, 1  ;;  %v3823_v23 = vld [vmem:[%s3782_s29 + $0x40] sm:$0x3]  ;;  %v3826_v25 = vld [vmem:[%s3782_s29 + $0x48] sm:$0xff]  ;;  %v305_v29 = vrot.slane %v3813_v17, 1  ;;  %v3850_v37 = vld [vmem:[%s3782_s29 + $0x78] sm:$0xff] }
  0x17   : > { %v407_v24 = vpack.c.bf16 %v299_v19, %v297_v18  ;;  %v302_v27 = vsel %vm294_vm0, %v300_v16, %v301_v20  ;;  %v306_v30 = vrot.slane %v3820_v22, 1  ;;  %v3836_v31 = vld [vmem:[%s3782_s29 + $0x58] sm:$0x3]  ;;  %v3839_v32 = vld [vmem:[%s3782_s29 + $0x60] sm:$0xff]  ;;  %v3842_v33 = vld [vmem:[%s3782_s29 + $0x68] sm:$0xff]  ;;  %v308_v35 = vrot.slane %v3823_v23, 1 }
  0x18   : > { %v304_v28 = vsel %vm294_vm0, %v301_v20, %v303_v21  ;;  %v3847_v36 = vld [vmem:[%s3782_s29 + $0x70] sm:$0x3]  ;;  %v310_v39 = vrot.slane %v3826_v25, 1  ;;  %v311_v40 = vrot.slane %v3829_v26, 1  ;;  %v3856_v41 = vld [vmem:[%s3782_s29 + $0x80] sm:$0xff]  ;;  %v313_v44 = vrot.slane %v3836_v31, 1 }
  0x19   : > { %3106 = vmatprep.mubr.msk.bf16.mxu1 %vm440_vm1, %v407_v24  ;;  %v408_v34 = vpack.c.bf16 %v304_v28, %v302_v27  ;;  %v307_v38 = vsel %vm294_vm0, %v305_v29, %v306_v30  ;;  %v3859_v42 = vld [vmem:[%s3782_s29 + $0x88] sm:$0x3]  ;;  %v309_v43 = vsel %vm294_vm0, %v306_v30, %v308_v35  ;;  %v315_v45 = vrot.slane %v3839_v32, 1  ;;  %v3891_v59 = vld [vmem:[%s3782_s29 + $0x90] sm:$0xff]  ;;  %v3898_v62 = vld [vmem:[%s3782_s29 + $0x98] sm:$0xff] }
  0x1a   : > { %v316_v46 = vrot.slane %v3842_v33, 1  ;;  %v3867_v47 = vpack.c.bf16 %v309_v43, %v307_v38  ;;  %v312_v48 = vsel %vm294_vm0, %v310_v39, %v311_v40  ;;  %v318_v49 = vrot.slane %v3847_v36, 1  ;;  %v3901_v63 = vld [vmem:[%s3782_s29 + $0xa0] sm:$0x3]  ;;  %v3909_v2 = vld [vmem:[%s3782_s29 + $0xa8] sm:$0xff]  ;;  %v4159_v1 = vld [vmem:[%s3782_s29 + $0x170] sm:$0xff] }
  0x1b   : > { %3250 = vmatprep.mubr.msk.bf16.mxu0 %vm440_vm1, %v408_v34  ;;  %3107 = vmatmul.mubr.msk.bf16.vlgmr.msra.gmra.mrb[0].mxu1 %vm440_vm1, %v408_v34  ;;  %v320_v50 = vrot.slane %v3850_v37, 1  ;;  %v314_v52 = vsel %vm294_vm0, %v311_v40, %v313_v44  ;;  %v321_v53 = vrot.slane %v3856_v41, 1  ;;  %v323_v54 = vrot.slane %v3859_v42, 1  ;;  %v3935_v24 = vld [vmem:[%s3782_s29 + $0xc0] sm:$0xff]  ;;  %v3942_v29 = vld [vmem:[%s3782_s29 + $0xc8] sm:$0xff] }
  0x1c   : > { %3139 = vmatpush3.bf16.msra.mxu1 %v3699_v4  ;;  %4740 = vst [vmem:[#allocation4_spill] sm:$0xff] %v3867_v47  ;;  %3251 = vmatmul.mubr.msk.bf16.vlgmr.msra.gmra.mrb[0].mxu0 %vm440_vm1, %v3867_v47  ;;  %v3885_v56 = vpack.c.bf16 %v314_v52, %v312_v48  ;;  %v317_v57 = vsel %vm294_vm0, %v315_v45, %v316_v46  ;;  %v3912_v4 = vld [vmem:[%s3782_s29 + $0xb0] sm:$0xff]  ;;  %v325_v11 = vrot.slane %v3891_v59, 1  ;;  %v326_v16 = vrot.slane %v3898_v62, 1  ;;  %v3947_v30 = vld [vmem:[%s4708_s1 + $0x20] sm:$0xff]  }
  0x1d   : > { %3110 = vmatprep.mubr.msk.bf16.mxu1 %vm440_vm1, %v3867_v47  ;;  %3283 = vmatpush3.bf16.msra.mxu0 %v3777_v5  ;;  %v319_v58 = vsel %vm294_vm0, %v316_v46, %v318_v49  ;;  %v322_v60 = vsel %vm294_vm0, %v320_v50, %v321_v53  ;;  %v324_v61 = vsel %vm294_vm0, %v321_v53, %v323_v54  ;;  %v3915_v5 = vld [vmem:[%s3782_s29 + $0xb8] sm:$0x3]  ;;  %v328_v18 = vrot.slane %v3901_v63, 1  ;;  %v3952_v38 = vld [vmem:[%s3782_s29 + $0xd0] sm:$0x3] }
  0x1e   : > { %4741 = vst [vmem:[#allocation5_spill] sm:$0xff] %v3885_v56  ;;  %3140 = vmatprep.subr.bf16.mxu1 %v3702_v55  ;;  %3254 = vmatprep.mubr.msk.bf16.mxu0 %vm440_vm1, %v3885_v56  ;;  %v3917_v9 = vpack.c.bf16 %v319_v58, %v317_v57  ;;  %v3921_v10 = vpack.c.bf16 %v324_v61, %v322_v60  ;;  %v330_v19 = vrot.slane %v3909_v2, 1  ;;  %v331_v20 = vrot.slane %v3912_v4, 1  ;;  %v3964_v49 = vld [vmem:[%s3782_s29 + $0xd8] sm:$0xff]  ;;  %v3977_v50 = vld [vmem:[%s3782_s29 + $0xe8] sm:$0x3] }
  0x1f   : > { %3284 = vmatprep.subr.bf16.mxu0 %v3701_v51  ;;  %v333_v21 = vrot.slane %v3915_v5, 1  ;;  %v327_v27 = vsel %vm294_vm0, %v325_v11, %v326_v16  ;;  %v329_v28 = vsel %vm294_vm0, %v326_v16, %v328_v18  ;;  %v877_v39 = vrot.slane %v3798_v12, 2  ;;  %v3982_v53 = vld [vmem:[%s3782_s29 + $0xf0] sm:$0xff]  ;;  %v3985_v54 = vld [vmem:[%s3782_s29 + $0xf8] sm:$0xff]  ;;  %v3993_v60 = vld [vmem:[%s3782_s29 + $0x100] sm:$0x3] }
  0x20   : > { %3141 = vmatpush3.bf16.msra.mxu1 %v3702_v55  ;;  %4742 = vst [vmem:[#allocation6_spill] sm:$0xff] %v3917_v9  ;;  %4743 = vst [vmem:[#allocation7_spill] sm:$0xff] %v3921_v10  ;;  %v332_v34 = vsel %vm294_vm0, %v330_v19, %v331_v20  ;;  %v878_v40 = vrot.slane %v3801_v13, 2  ;;  %v880_v43 = vrot.slane %v3804_v14, 2  ;;  %v882_v44 = vrot.slane %v3813_v17, 2  ;;  %v3972_v14 = vld [vmem:[%s3782_s29 + $0xe0] sm:$0xff] }
  0x21   : > { %3285 = vmatpush3.bf16.msra.mxu0 %v3701_v51  ;;  %v334_v35 = vsel %vm294_vm0, %v331_v20, %v333_v21  ;;  %3174 = vmatprep.subr.bf16.mxu1 %v3947_v30  ;;  %v3959_v45 = vpack.c.bf16 %v329_v28, %v327_v27  ;;  %v335_v46 = vrot.slane %v3935_v24, 1  ;;  %v336_v48 = vrot.slane %v3942_v29, 1  ;;  %v4004_v20 = vld [vmem:[%s3782_s29 + $0x108] sm:$0xff]  ;;  %v4008_v27 = vld [vmem:[%s3782_s29 + $0x110] sm:$0xff] }
  0x22   : > { %3318 = vmatprep.subr.bf16.mxu0 %v3906_v0  ;;  %v3968_v12 = vpack.c.bf16 %v334_v35, %v332_v34  ;;  %v338_v13 = vrot.slane %v3952_v38, 1  ;;  %v883_v51 = vrot.slane %v3820_v22, 2  ;;  %v885_v52 = vrot.slane %v3823_v23, 2  ;;  %v4015_v35 = vld [vmem:[%s3782_s29 + $0x118] sm:$0x3] }
  0x23   : > { %3111 = vmatmul.mubr.msk.bf16.gmra.mrb[4].mxu1 %vm440_vm1, %v3885_v56  ;;  %4744 = vst [vmem:[#allocation8_spill] sm:$0xff] %v3959_v45  ;;  %v337_v55 = vsel %vm294_vm0, %v335_v46, %v336_v48  ;;  %v879_v57 = vsel %vm871_vm2, %v877_v39, %v878_v40  ;;  %v881_v58 = vsel %vm871_vm2, %v878_v40, %v880_v43  ;;  %v340_v61 = vrot.slane %v3964_v49, 1 }
  0x24   : > { %3114 = vmatprep.mubr.msk.bf16.mxu1 %vm440_vm1, %v3917_v9  ;;  %3255 = vmatmul.mubr.msk.bf16.gmra.mrb[4].mxu0 %vm440_vm1, %v3917_v9  ;;  %4745 = vst [vmem:[#allocation9_spill] sm:$0xff] %v3968_v12  ;;  %v339_v23 = vsel %vm294_vm0, %v336_v48, %v338_v13  ;;  %v341_v11 = vrot.slane %v3972_v14, 1  ;;  %v343_v16 = vrot.slane %v3977_v50, 1  ;;  %v345_v18 = vrot.slane %v3982_v53, 1  ;;  %v4024_v48 = vld [vmem:[%s3782_s29 + $0x120] sm:$0xff]  ;;  %v4062_v9 = vld [vmem:[%s3782_s29 + $0x138] sm:$0xff] }
  0x25   : > { %3258 = vmatprep.mubr.msk.bf16.mxu0 %vm440_vm1, %v3921_v10  ;;  %v346_v19 = vrot.slane %v3985_v54, 1  ;;  %v348_v21 = vrot.slane %v3993_v60, 1  ;;  %v4010_v28 = vpack.c.bf16 %v339_v23, %v337_v55  ;;  %v4012_v34 = vpack.c.bf16 %v881_v58, %v879_v57  ;;  %v4033_v23 = vld [vmem:[%s3782_s29 + $0x128] sm:$0xff] }
  0x26   : > { %v342_v39 = vsel %vm294_vm0, %v340_v61, %v341_v11  ;;  %v344_v40 = vsel %vm294_vm0, %v341_v11, %v343_v16  ;;  %v884_v43 = vsel %vm871_vm2, %v882_v44, %v883_v51  ;;  %v886_v46 = vsel %vm871_vm2, %v883_v51, %v885_v52  ;;  %v4036_v61 = vld [vmem:[%s3782_s29 + $0x130] sm:$0x3] }
  0x27   : > { %4746 = vst [vmem:[#allocation10_spill] sm:$0xff] %v4010_v28  ;;  %v347_v13 = vsel %vm294_vm0, %v345_v18, %v346_v19  ;;  %v887_v55 = vrot.slane %v3826_v25, 2  ;;  %v888_v57 = vrot.slane %v3829_v26, 2  ;;  %v890_v58 = vrot.slane %v3836_v31, 2 }
  0x28   : > { %v349_v44 = vsel %vm294_vm0, %v346_v19, %v348_v21  ;;  %v350_v51 = vrot.slane %v4004_v20, 1  ;;  %v351_v52 = vrot.slane %v4008_v27, 1  ;;  %v353_v11 = vrot.slane %v4015_v35, 1 }
  0x29   : > { %v4046_v31 = vpack.c.bf16 %v344_v40, %v342_v39  ;;  %v355_v16 = vrot.slane %v4024_v48, 1  ;;  %v356_v18 = vrot.slane %v4033_v23, 1  ;;  %v358_v19 = vrot.slane %v4036_v61, 1 }
  0x2a   : > { %v4051_v21 = vpack.c.bf16 %v886_v46, %v884_v43  ;;  %v4053_v3 = vpack.c.bf16 %v349_v44, %v347_v13  ;;  %v354_v39 = vsel %vm294_vm0, %v351_v52, %v353_v11  ;;  %v892_v40 = vrot.slane %v3839_v32, 2  ;;  %v4065_v43 = vld [vmem:[%s3782_s29 + $0x140] sm:$0xff]  ;;  %v4085_v11 = vld [vmem:[%s3782_s29 + $0x150] sm:$0xff] }
  0x2b   : > { %3115 = vmatmul.mubr.msk.bf16.gmra.mrb[8].mxu1 %vm440_vm1, %v3921_v10  ;;  %4747 = vst [vmem:[#allocation11_spill] sm:$0xff] %v4046_v31  ;;  %v893_v10 = vrot.slane %v3842_v33, 2  ;;  %v895_v46 = vrot.slane %v3847_v36, 2  ;;  %v897_v13 = vrot.slane %v3850_v37, 2  ;;  %v900_v36 = vrot.slane %v3859_v42, 2 }
  0x2c   : > { %3118 = vmatprep.mubr.msk.bf16.mxu1 %vm440_vm1, %v3959_v45  ;;  %3259 = vmatmul.mubr.msk.bf16.gmra.mrb[8].mxu0 %vm440_vm1, %v3959_v45  ;;  %4748 = vst [vmem:[#allocation12_spill] sm:$0xff] %v4051_v21  ;;  %4749 = vst [vmem:[#allocation13_spill] sm:$0xff] %v4053_v3  ;;  %v352_v45 = vsel %vm294_vm0, %v350_v51, %v351_v52  ;;  %v357_v51 = vsel %vm294_vm0, %v355_v16, %v356_v18  ;;  %v360_v56 = vrot.slane %v4062_v9, 1 }
  0x2d   : > { %3262 = vmatprep.mubr.msk.bf16.mxu0 %vm440_vm1, %v3968_v12  ;;  %v359_v52 = vsel %vm294_vm0, %v356_v18, %v358_v19  ;;  %v894_v42 = vsel %vm871_vm2, %v892_v40, %v893_v10  ;;  %v4106_v18 = vpack.c.bf16 %v3829_v26, %v3826_v25  ;;  %v896_v19 = vsel %vm871_vm2, %v893_v10, %v895_v46 }
  0x2e   : > { %v365_v26 = vrot.slane %v4085_v11, 1  ;;  %v902_v46 = vrot.slane %v3891_v59, 2 }
  0x33   : > { %3119 = vmatmul.mubr.msk.bf16.gmra.mrb[12].mxu1 %vm440_vm1, %v3968_v12  ;;  %v889_v12 = vsel %vm871_vm2, %v887_v55, %v888_v57  ;;  %v898_v55 = vrot.slane %v3856_v41, 2 }
  0x34   : > { %3122 = vmatprep.mubr.msk.bf16.mxu1 %vm440_vm1, %v4010_v28  ;;  %3263 = vmatmul.mubr.msk.bf16.gmra.mrb[12].mxu0 %vm440_vm1, %v4010_v28  ;;  %v891_v28 = vsel %vm871_vm2, %v888_v57, %v890_v58  ;;  %v4071_v57 = vld [vmem:[%s3782_s29 + $0x148] sm:$0x3]  ;;  %v4075_v58 = vpack.c.bf16 %v3820_v22, %v3813_v17  ;;  %v361_v17 = vrot.slane %v4065_v43, 1  ;;  %v4092_v22 = vld [vmem:[%s3782_s29 + $0x158] sm:$0xff] }
  0x35   : > { %3286 = vmatprep.mubr.msk.bf16.mxu0 %vm440_vm1, %v4012_v34  ;;  %v4079_v44 = vpack.c.bf16 %v891_v28, %v889_v12  ;;  %v3705_v12 = vld [vmem:[%s4708_s1 + $0x68] sm:$0xff]   ;;  %v4100_v28 = vpack.c.bf16 %v354_v39, %v352_v45  ;;  %v363_v16 = vrot.slane %v4071_v57, 1  ;;  %v899_v47 = vsel %vm871_vm2, %v897_v13, %v898_v55 }
  0x36   : > { %v4116_v45 = vpack.c.bf16 %v3842_v33, %v3839_v32  ;;  %v901_v25 = vsel %vm871_vm2, %v898_v55, %v900_v36  ;;  %v366_v10 = vrot.slane %v4092_v22, 1  ;;  %v362_v40 = vsel %vm294_vm0, %v360_v56, %v361_v17 }
  0x37   : > { %4750 = vst [vmem:[#allocation14_spill] sm:$0xff] %v4079_v44  ;;  %4751 = vst [vmem:[#allocation15_spill] sm:$0xff] %v4100_v28  ;;  %v903_v32 = vrot.slane %v3898_v62, 2  ;;  %v4130_v33 = vpack.c.bf16 %v3856_v41, %v3850_v37  ;;  %v364_v13 = vsel %vm294_vm0, %v361_v17, %v363_v16  ;;  %v905_v56 = vrot.slane %v3901_v63, 2  ;;  %v4147_v41 = vld [vmem:[%s3782_s29 + $0x168] sm:$0xff] }
  0x38   : > { %v907_v55 = vrot.slane %v3909_v2, 2  ;;  %v4142_v36 = vpack.c.bf16 %v896_v19, %v894_v42  ;;  %v4144_v37 = vpack.c.bf16 %v901_v25, %v899_v47  ;;  %v367_v63 = vsel %vm294_vm0, %v365_v26, %v366_v10  ;;  %v4162_v42 = vld [vmem:[%s3782_s29 + $0x178] sm:$0x3] }
  0x39   : > { %v910_v16 = vrot.slane %v3915_v5, 2  ;;  %v4166_v47 = vpack.c.bf16 %v3912_v4, %v3909_v2  ;;  %v4172_v19 = vpack.c.bf16 %v364_v13, %v362_v40  ;;  %v904_v5 = vsel %vm871_vm2, %v902_v46, %v903_v32 }
  0x3a   : > { %4753 = vst [vmem:[#allocation17_spill] sm:$0xff] %v4142_v36  ;;  %4754 = vst [vmem:[#allocation18_spill] sm:$0xff] %v4144_v37  ;;  %v906_v25 = vsel %vm871_vm2, %v903_v32, %v905_v56  ;;  %v370_v2 = vrot.slane %v4147_v41, 1  ;;  %v371_v26 = vrot.slane %v4159_v1, 1  ;;  %v4198_v46 = vpack.c.bf16 %v3985_v54, %v3982_v53 }
  0x3b   : > { %3123 = vmatmul.mubr.msk.bf16.gmra.mrb[16].mxu1 %vm440_vm1, %v4046_v31  ;;  %v4095_v31 = vld [vmem:[%s3782_s29 + $0x160] sm:$0x3]  ;;  %v4202_v32 = vpack.c.bf16 %v4008_v27, %v4004_v20  ;;  %v4206_v13 = vpack.c.bf16 %v4033_v23, %v4024_v48  ;;  %v4210_v56 = vpack.c.bf16 %v4065_v43, %v4062_v9 }
  0x3c   : > { %3126 = vmatprep.mubr.msk.bf16.mxu1 %vm440_vm1, %v4053_v3  ;;  %3287 = vmatmul.mubr.msk.bf16.vlgmr.msra.gmra.mrb[0].mxu0 %vm440_vm1, %v4051_v21  ;;  %v4111_v3 = vpack.c.bf16 %v359_v52, %v357_v51  ;;  %v368_v39 = vrot.slane %v4095_v31, 1  ;;  %v908_v51 = vrot.slane %v3912_v4, 2  ;;  %v872_v52 = vrot.slane %v3785_v6, 2 }
  0x3d   : > { %3319 = vmatpush3.bf16.msra.mxu0 %v3906_v0  ;;  %3290 = vmatprep.mubr.msk.bf16.mxu0 %vm440_vm1, %v4079_v44  ;;  %v4135_v0 = vld [vmem:[%s4708_s1 + $0x70] sm:$0xff]   ;;  %v4151_v44 = vpack.c.bf16 %v3898_v62, %v3891_v59  ;;  %v873_v59 = vrot.slane %v3788_v7, 2  ;;  %v875_v62 = vrot.slane %v3791_v8, 2  ;;  %v4181_v4 = vpack.c.bf16 %v3942_v29, %v3935_v24 }
  0x3e   : > { %4752 = vst [vmem:[#allocation16_spill] sm:$0xff] %v4111_v3  ;;  %3320 = vmatprep.subr.bf16.mxu0 %v3705_v12  ;;  %v369_v17 = vsel %vm294_vm0, %v366_v10, %v368_v39  ;;  %v373_v10 = vrot.slane %v4162_v42, 1  ;;  %v4191_v39 = vpack.c.bf16 %v3972_v14, %v3964_v49  ;;  %v911_v40 = vsel %vm871_vm2, %v908_v51, %v910_v16 }
  0x3f   : > { %v4185_v8 = vpack.c.bf16 %v369_v17, %v367_v63  ;;  %v4221_v63 = vsel %vm871_vm2, %v872_v52, %v873_v59  ;;  %v4224_v17 = vsel %vm871_vm2, %v873_v59, %v875_v62  ;;  %v4226_v16 = vpack.c.bf16 %v906_v25, %v904_v5 }
  0x40   : > { %v913_v52 = vrot.slane %v3942_v29, 2  ;;  %v915_v21 = vrot.slane %v3952_v38, 2  ;;  %v374_v59 = vsel %vm294_vm0, %v371_v26, %v373_v10  ;;  %v918_v62 = vrot.slane %v3972_v14, 2 }
  0x41   : > { %3321 = vmatpush3.bf16.msra.mxu0 %v3705_v12  ;;  %v909_v12 = vsel %vm871_vm2, %v907_v55, %v908_v51  ;;  %v4214_v55 = vpack.c.bf16 %v4092_v22, %v4085_v11  ;;  %v4218_v51 = vpack.c.bf16 %v4159_v1, %v4147_v41  ;;  %v920_v5 = vrot.slane %v3977_v50, 2 }
  0x42   : > { %3354 = vmatprep.subr.bf16.mxu0 %v4135_v0  ;;  %v916_v25 = vsel %vm871_vm2, %v913_v52, %v915_v21  ;;  %v925_v21 = vrot.slane %v3993_v60, 2 }
  0x43   : > { %3127 = vmatmul.mubr.msk.bf16.gmra.mrb[20].mxu1 %vm440_vm1, %v4100_v28  ;;  %v984_v28 = vpack.c.bf16 %v4224_v17, %v4221_v63  ;;  %v921_v14 = vsel %vm871_vm2, %v918_v62, %v920_v5  ;;  %v940_v5 = vrot.slane %v4071_v57, 2  ;;  %v4757_v63 = vld [vmem:[#allocation14_spill] sm:$0xff] }
  0x44   : > { %3130 = vmatprep.mubr.msk.bf16.mxu1 %vm440_vm1, %v4111_v3  ;;  %3291 = vmatmul.mubr.msk.bf16.gmra.mrb[4].mxu0 %vm440_vm1, %v4142_v36  ;;  %v912_v3 = vrot.slane %v3935_v24, 2  ;;  %v372_v36 = vsel %vm294_vm0, %v370_v2, %v371_v26  ;;  %v917_v24 = vrot.slane %v3964_v49, 2  ;;  %v930_v26 = vrot.slane %v4015_v35, 2  ;;  %v4759_v17 = vld [vmem:[#allocation18_spill] sm:$0xff] }
  0x45   : > { %3294 = vmatprep.mubr.msk.bf16.mxu0 %vm440_vm1, %v4144_v37  ;;  %v4233_v37 = vpack.c.bf16 %v911_v40, %v909_v12  ;;  %v4248_v29 = vpack.c.bf16 %v374_v59, %v372_v36  ;;  %v226_v12 = vpack.c.bf16 %v3788_v7, %v3785_v6  ;;  %v922_v36 = vrot.slane %v3982_v53, 2 }
  0x46   : > { %v914_v38 = vsel %vm871_vm2, %v912_v3, %v913_v52  ;;  %v919_v49 = vsel %vm871_vm2, %v917_v24, %v918_v62  ;;  %v923_v3 = vrot.slane %v3985_v54, 2  ;;  %v927_v6 = vrot.slane %v4004_v20, 2  ;;  %v3706_v20 = vld [vmem:[%s4708_s1 + $0x28] sm:$0xff]  }
  0x47   : > { %v4256_v50 = vpack.c.bf16 %v916_v25, %v914_v38  ;;  %v4260_v2 = vpack.c.bf16 %v921_v14, %v919_v49  ;;  %v928_v7 = vrot.slane %v4008_v27, 2  ;;  %v932_v40 = vrot.slane %v4024_v48, 2  ;;  %v4298_v48 = vld [vmem:[%s4708_s1 + $0x30] sm:$0xff]  }
  0x48   : > { %v924_v53 = vsel %vm871_vm2, %v922_v36, %v923_v3  ;;  %v926_v54 = vsel %vm871_vm2, %v923_v3, %v925_v21  ;;  %v933_v52 = vrot.slane %v4033_v23, 2  ;;  %v935_v59 = vrot.slane %v4036_v61, 2  ;;  %v220_v21 = vld [vmem:[%s3782_s29 + $0x180] sm:$0xff] }
  0x49   : > { %v929_v60 = vsel %vm871_vm2, %v927_v6, %v928_v7  ;;  %v931_v10 = vsel %vm871_vm2, %v928_v7, %v930_v26  ;;  %v4280_v27 = vpack.c.bf16 %v926_v54, %v924_v53  ;;  %v937_v24 = vrot.slane %v4062_v9, 2  ;;  %v222_v6 = vld [vmem:[%s3782_s29 + $0x190] sm:$0x3] }
  0x4a   : > { %v4284_v35 = vpack.c.bf16 %v931_v10, %v929_v60  ;;  %v938_v62 = vrot.slane %v4065_v43, 2  ;;  %v936_v9 = vsel %vm871_vm2, %v933_v52, %v935_v59  ;;  %v942_v38 = vrot.slane %v4085_v11, 2 }
  0x4b   : > { %3131 = vmatmul.mubr.msk.bf16.gmra.mrb[24].mxu1 %vm440_vm1, %v4172_v19  ;;  %v943_v25 = vrot.slane %v4092_v22, 2  ;;  %v947_v49 = vrot.slane %v4147_v41, 2  ;;  %v948_v14 = vrot.slane %v4159_v1, 2  ;;  %v950_v36 = vrot.slane %v4162_v42, 2  ;;  %v221_v41 = vld [vmem:[%s3782_s29 + $0x188] sm:$0xff] }
  0x4c   : > { %3134 = vmatprep.mubr.msk.bf16.mxu1 %vm440_vm1, %v4185_v8  ;;  %3295 = vmatmul.mubr.msk.bf16.gmra.mrb[8].mxu0 %vm440_vm1, %v4226_v16  ;;  %v939_v23 = vsel %vm871_vm2, %v937_v24, %v938_v62  ;;  %v941_v61 = vsel %vm871_vm2, %v938_v62, %v940_v5  ;;  %v1696_v7 = vrot.slane %v220_v21, 2  ;;  %v1697_v26 = vrot.slane %v221_v41, 2  ;;  %v3709_v5 = vld [vmem:[%s4708_s1 + $0x78] sm:$0xff]  }
  0x4d   : > { %3298 = vmatprep.mubr.msk.bf16.mxu0 %vm440_vm1, %v4233_v37  ;;  %v4313_v57 = vpack.c.bf16 %v941_v61, %v939_v23  ;;  %v944_v11 = vsel %vm871_vm2, %v942_v38, %v943_v25  ;;  %v951_v3 = vsel %vm871_vm2, %v948_v14, %v950_v36  ;;  %v1699_v53 = vrot.slane %v222_v6, 2  ;;  %v223_v23 = vld [vmem:[%s3782_s29 + $0x198] sm:$0xff]  ;;  %v224_v61 = vld [vmem:[%s3782_s29 + $0x1a0] sm:$0xff] }
  0x4e   : > { %v1475_v54 = vrot.slane %v220_v21, 1  ;;  %v1476_v60 = vrot.slane %v221_v41, 1  ;;  %v1478_v10 = vrot.slane %v222_v6, 1  ;;  %v2355_v38 = vrot.slane %v223_v23, 2  ;;  %v4763_v6 = vld [vmem:[#allocation7_spill] sm:$0xff] }
  0x50   : > { %v1479_v59 = vsel %vm294_vm0, %v1476_v60, %v1478_v10  ;;  %v4769_v10 = vld [vmem:[#allocation3_spill] sm:$0xff] }
  0x53   : > { %3135 = vmatmul.mubr.msk.bf16.gmra.mrb[28].mxu1 %vm440_vm1, %v4248_v29 }
  0x54   : > { %3142 = vmatprep.mubr.msk.bf16.mxu1 %vm440_vm1, %v226_v12  ;;  %3299 = vmatmul.mubr.msk.bf16.gmra.mrb[12].mxu0 %vm440_vm1, %v4256_v50  ;;  %v945_v12 = vrot.slane %v4095_v31, 2  ;;  %v949_v31 = vsel %vm871_vm2, %v947_v49, %v948_v14  ;;  %v1917_v14 = vpack.c.bf16 %v224_v61, %v223_v23 }
  0x55   : > { %3302 = vmatprep.mubr.msk.bf16.mxu0 %vm440_vm1, %v4260_v2  ;;  %v4338_v42 = vpack.c.bf16 %v951_v3, %v949_v31  ;;  %v4760_v31 = vld [vmem:[#allocation4_spill] sm:$0xff]  ;;  %v3712_v3 = vld [vmem:[%s4708_s1 + $0x88] sm:$0xff]  }
  0x56   : > { %v946_v22 = vsel %vm871_vm2, %v943_v25, %v945_v12  ;;  %v2356_v25 = vrot.slane %v224_v61, 2  ;;  %v225_v12 = vld [vmem:[%s3782_s29 + $0x1a8] sm:$0x3] }
  0x57   : > { %v4334_v1 = vpack.c.bf16 %v946_v22, %v944_v11  ;;  %v2358_v49 = vrot.slane %v225_v12, 2 }
  0x58   : > { %v4440_v36 = vsel %vm871_vm2, %v2355_v38, %v2356_v25 }
  0x59   : > { %v4443_v11 = vsel %vm871_vm2, %v2356_v25, %v2358_v49 }
  0x5a   : > { %v2362_v22 = vpack.c.bf16 %v4443_v11, %v4440_v36 }
  0x5b   : > { %3143 = vmatmul.mubr.msk.bf16.vlgmr.msra.gmra.mrb[0].mxu1 %vm440_vm1, %v3808_v15 }
  0x5c   : > { %3175 = vmatpush3.bf16.msra.mxu1 %v3947_v30  ;;  %3146 = vmatprep.mubr.msk.bf16.mxu1 %vm440_vm1, %v4075_v58  ;;  %v934_v30 = vsel %vm871_vm2, %v932_v40, %v933_v52  ;;  %v1700_v40 = vsel %vm871_vm2, %v1697_v26, %v1699_v53  ;;  %v1477_v52 = vsel %vm294_vm0, %v1475_v54, %v1476_v60  ;;  %v4766_v53 = vld [vmem:[#allocation10_spill] sm:$0xff]  ;;  %v4767_v54 = vld [vmem:[#allocation11_spill] sm:$0xff]  ;;  %v4768_v60 = vld [vmem:[#allocation13_spill] sm:$0xff] }
  0x5d   : > { %3176 = vmatprep.subr.bf16.mxu1 %v3706_v20  ;;  %3303 = vmatmul.mubr.msk.bf16.gmra.mrb[16].mxu0 %vm440_vm1, %v4280_v27  ;;  %v4309_v43 = vpack.c.bf16 %v936_v9, %v934_v30  ;;  %v4350_v24 = vpack.c.bf16 %v1479_v59, %v1477_v52  ;;  %v3711_v30 = vld [vmem:[%s4708_s1 + $0x80] sm:$0xff]   ;;  %v4755_v9 = vld [vmem:[#allocation12_spill] sm:$0xff] }
  0x5e   : > { %3306 = vmatprep.mubr.msk.bf16.mxu0 %vm440_vm1, %v4284_v35 }
  0x60   : > { %3177 = vmatpush3.bf16.msra.mxu1 %v3706_v20  ;;  %v1698_v20 = vsel %vm871_vm2, %v1696_v7, %v1697_v26  ;;  %v4764_v7 = vld [vmem:[#allocation8_spill] sm:$0xff]  ;;  %v4765_v26 = vld [vmem:[#allocation9_spill] sm:$0xff] }
  0x61   : > { %3210 = vmatprep.subr.bf16.mxu1 %v4298_v48  ;;  %v4352_v62 = vpack.c.bf16 %v1700_v40, %v1698_v20  ;;  %v4770_v20 = vld [vmem:[#allocation15_spill] sm:$0xff]  ;;  %v2137_v40 = vrot.slane %v225_v12, 1 }
  0x63   : > { %3147 = vmatmul.mubr.msk.bf16.gmra.mrb[4].mxu1 %vm440_vm1, %v4106_v18 }
  0x64   : > { %3150 = vmatprep.mubr.msk.bf16.mxu1 %vm440_vm1, %v4116_v45 }
  0x65   : > { %3307 = vmatmul.mubr.msk.bf16.gmra.mrb[20].mxu0 %vm440_vm1, %v4309_v43 }
  0x66   : > { %3310 = vmatprep.mubr.msk.bf16.mxu0 %vm440_vm1, %v4313_v57 }
  0x6b   : > { %3151 = vmatmul.mubr.msk.bf16.gmra.mrb[8].mxu1 %vm440_vm1, %v4130_v33 }
  0x6c   : > { %3154 = vmatprep.mubr.msk.bf16.mxu1 %vm440_vm1, %v4151_v44 }
  0x6d   : > { %3311 = vmatmul.mubr.msk.bf16.gmra.mrb[24].mxu0 %vm440_vm1, %v4334_v1 }
  0x6e   : > { %3314 = vmatprep.mubr.msk.bf16.mxu0 %vm440_vm1, %v4338_v42 }
  0x73   : > { %3155 = vmatmul.mubr.msk.bf16.gmra.mrb[12].mxu1 %vm440_vm1, %v4166_v47 }
  0x74   : > { %3158 = vmatprep.mubr.msk.bf16.mxu1 %vm440_vm1, %v4181_v4 }
  0x75   : > { %3315 = vmatmul.mubr.msk.bf16.gmra.mrb[28].mxu0 %vm440_vm1, %v4352_v62 }
  0x76   : > { %3322 = vmatprep.mubr.msk.bf16.mxu0 %vm440_vm1, %v4075_v58 }
  0x7b   : > { %3159 = vmatmul.mubr.msk.bf16.gmra.mrb[16].mxu1 %vm440_vm1, %v4191_v39 }
  0x7c   : > { %3162 = vmatprep.mubr.msk.bf16.mxu1 %vm440_vm1, %v4198_v46 }
  0x7d   : > { %3323 = vmatmul.mubr.msk.bf16.vlgmr.msra.gmra.mrb[0].mxu0 %vm440_vm1, %v4106_v18 }
  0x7e   : > { %3355 = vmatpush3.bf16.msra.mxu0 %v4135_v0  ;;  %3326 = vmatprep.mubr.msk.bf16.mxu0 %vm440_vm1, %v4116_v45  ;;  %v3710_v0 = vld [vmem:[%s4708_s1 + $0x38] sm:$0xff]  }
  0x7f   : > { %3356 = vmatprep.subr.bf16.mxu0 %v3709_v5 }
  0x82   : > { %3357 = vmatpush3.bf16.msra.mxu0 %v3709_v5 }
  0x83   : > { %3163 = vmatmul.mubr.msk.bf16.gmra.mrb[20].mxu1 %vm440_vm1, %v4202_v32  ;;  %3390 = vmatprep.subr.bf16.mxu0 %v3711_v30 }
  0x84   : > { %3166 = vmatprep.mubr.msk.bf16.mxu1 %vm440_vm1, %v4206_v13 }
  0x85   : > { %3327 = vmatmul.mubr.msk.bf16.gmra.mrb[4].mxu0 %vm440_vm1, %v4130_v33 }
  0x86   : > { %3330 = vmatprep.mubr.msk.bf16.mxu0 %vm440_vm1, %v4151_v44 }
  0x8b   : > { %3167 = vmatmul.mubr.msk.bf16.gmra.mrb[24].mxu1 %vm440_vm1, %v4210_v56 }
  0x8c   : > { %3170 = vmatprep.mubr.msk.bf16.mxu1 %vm440_vm1, %v4214_v55 }
  0x8d   : > { %3331 = vmatmul.mubr.msk.bf16.gmra.mrb[8].mxu0 %vm440_vm1, %v4166_v47 }
  0x8e   : > { %3334 = vmatprep.mubr.msk.bf16.mxu0 %vm440_vm1, %v4181_v4 }
  0x93   : > { %3171 = vmatmul.mubr.msk.bf16.gmra.mrb[28].mxu1 %vm440_vm1, %v4218_v51 }
  0x94   : > { %3178 = vmatprep.mubr.msk.bf16.mxu1 %vm440_vm1, %v984_v28  ;;  %v4756_v28 = vld [vmem:[#allocation2_spill] sm:$0xff] }
  0x95   : > { %3335 = vmatmul.mubr.msk.bf16.gmra.mrb[12].mxu0 %vm440_vm1, %v4191_v39 }
  0x96   : > { %3338 = vmatprep.mubr.msk.bf16.mxu0 %vm440_vm1, %v4198_v46 }
  0x9b   : > { %3179 = vmatmul.mubr.msk.bf16.vlgmr.msra.gmra.mrb[0].mxu1 %vm440_vm1, %v4012_v34  ;;  %v4758_v34 = vld [vmem:[#allocation17_spill] sm:$0xff] }
  0x9c   : > { %3211 = vmatpush3.bf16.msra.mxu1 %v4298_v48  ;;  %3182 = vmatprep.mubr.msk.bf16.mxu1 %vm440_vm1, %v4755_v9  ;;  %v4426_v48 = vpack.c.bf16 %v221_v41, %v220_v21  ;;  %v4761_v21 = vld [vmem:[#allocation5_spill] sm:$0xff]  ;;  %v4762_v41 = vld [vmem:[#allocation6_spill] sm:$0xff] }
  0x9d   : > { %3212 = vmatprep.subr.bf16.mxu1 %v3710_v0  ;;  %3339 = vmatmul.mubr.msk.bf16.gmra.mrb[16].mxu0 %vm440_vm1, %v4202_v32 }
  0x9e   : > { %3342 = vmatprep.mubr.msk.bf16.mxu0 %vm440_vm1, %v4206_v13 }
  0xa0   : > { %3213 = vmatpush3.bf16.msra.mxu1 %v3710_v0 }
  0xa1   : > { %3426 = vmatprep.subr.bf16.mxu1 %v4756_v28 }
  0xa3   : > { %3183 = vmatmul.mubr.msk.bf16.gmra.mrb[4].mxu1 %vm440_vm1, %v4757_v63 }
  0xa4   : > { %3186 = vmatprep.mubr.msk.bf16.mxu1 %vm440_vm1, %v4758_v34 }
  0xa5   : > { %3343 = vmatmul.mubr.msk.bf16.gmra.mrb[20].mxu0 %vm440_vm1, %v4210_v56 }
  0xa6   : > { %3346 = vmatprep.mubr.msk.bf16.mxu0 %vm440_vm1, %v4214_v55 }
  0xab   : > { %3187 = vmatmul.mubr.msk.bf16.gmra.mrb[8].mxu1 %vm440_vm1, %v4759_v17 }
  0xac   : > { %3190 = vmatprep.mubr.msk.bf16.mxu1 %vm440_vm1, %v4226_v16 }
  0xad   : > { %3347 = vmatmul.mubr.msk.bf16.gmra.mrb[24].mxu0 %vm440_vm1, %v4218_v51 }
  0xae   : > { %3350 = vmatprep.mubr.msk.bf16.mxu0 %vm440_vm1, %v4426_v48 }
  0xb3   : > { %3191 = vmatmul.mubr.msk.bf16.gmra.mrb[12].mxu1 %vm440_vm1, %v4233_v37 }
  0xb4   : > { %3194 = vmatprep.mubr.msk.bf16.mxu1 %vm440_vm1, %v4256_v50 }
  0xb5   : > { %3351 = vmatmul.mubr.msk.bf16.gmra.mrb[28].mxu0 %vm440_vm1, %v1917_v14 }
  0xb6   : > { %3358 = vmatprep.mubr.msk.bf16.mxu0 %vm440_vm1, %v4760_v31 }
  0xbb   : > { %3195 = vmatmul.mubr.msk.bf16.gmra.mrb[16].mxu1 %vm440_vm1, %v4260_v2 }
  0xbc   : > { %3198 = vmatprep.mubr.msk.bf16.mxu1 %vm440_vm1, %v4280_v27 }
  0xbd   : > { %3359 = vmatmul.mubr.msk.bf16.vlgmr.msra.gmra.mrb[0].mxu0 %vm440_vm1, %v4761_v21 }
  0xbe   : > { %3391 = vmatpush3.bf16.msra.mxu0 %v3711_v30  ;;  %3362 = vmatprep.mubr.msk.bf16.mxu0 %vm440_vm1, %v4762_v41 }
  0xbf   : > { %3392 = vmatprep.subr.bf16.mxu0 %v3712_v3 }
  0xc2   : > { %3393 = vmatpush3.bf16.msra.mxu0 %v3712_v3 }
  0xc3   : > { %3199 = vmatmul.mubr.msk.bf16.gmra.mrb[20].mxu1 %vm440_vm1, %v4284_v35 }
  0xc4   : > { %3202 = vmatprep.mubr.msk.bf16.mxu1 %vm440_vm1, %v4309_v43 }
  0xc5   : > { %3363 = vmatmul.mubr.msk.bf16.gmra.mrb[4].mxu0 %vm440_vm1, %v4763_v6 }
  0xc6   : > { %3366 = vmatprep.mubr.msk.bf16.mxu0 %vm440_vm1, %v4764_v7 }
  0xcb   : > { %3203 = vmatmul.mubr.msk.bf16.gmra.mrb[24].mxu1 %vm440_vm1, %v4313_v57 }
  0xcc   : > { %3206 = vmatprep.mubr.msk.bf16.mxu1 %vm440_vm1, %v4334_v1 }
  0xcd   : > { %3367 = vmatmul.mubr.msk.bf16.gmra.mrb[8].mxu0 %vm440_vm1, %v4765_v26 }
  0xce   : > { %3370 = vmatprep.mubr.msk.bf16.mxu0 %vm440_vm1, %v4766_v53 }
  0xd3   : > { %3207 = vmatmul.mubr.msk.bf16.gmra.mrb[28].mxu1 %vm440_vm1, %v4338_v42 }
  0xd4   : > { %3214 = vmatprep.mubr.msk.bf16.mxu1 %vm440_vm1, %v3808_v15  ;;  %v4771_v15 = vld [vmem:[#allocation16_spill] sm:$0xff] }
  0xd5   : > { %3371 = vmatmul.mubr.msk.bf16.gmra.mrb[12].mxu0 %vm440_vm1, %v4767_v54 }
  0xd6   : > { %3374 = vmatprep.mubr.msk.bf16.mxu0 %vm440_vm1, %v4768_v60 }
  0xdb   : > { %3215 = vmatmul.mubr.msk.bf16.vlgmr.msra.gmra.mrb[0].mxu1 %vm440_vm1, %v4075_v58  ;;  %v2134_v58 = vrot.slane %v223_v23, 1 }
  0xdc   : > { %3428 = vmatpush3.bf16.msra.mxu1 %v4756_v28  ;;  %3218 = vmatprep.mubr.msk.bf16.mxu1 %vm440_vm1, %v4106_v18  ;;  %v2135_v18 = vrot.slane %v224_v61, 1 }
  0xdd   : > { %3427 = vmatprep.subr.bf16.mxu1 %v4769_v10  ;;  %3375 = vmatmul.mubr.msk.bf16.gmra.mrb[16].mxu0 %vm440_vm1, %v4770_v20 }
  0xde   : > { %3378 = vmatprep.mubr.msk.bf16.mxu0 %vm440_vm1, %v4771_v15 }
  0xe0   : > { %3429 = vmatpush3.bf16.msra.mxu1 %v4769_v10 }
  0xe3   : > { %3219 = vmatmul.mubr.msk.bf16.gmra.mrb[4].mxu1 %vm440_vm1, %v4116_v45  ;;  %v2136_v45 = vsel %vm294_vm0, %v2134_v58, %v2135_v18 }
  0xe4   : > { %3222 = vmatprep.mubr.msk.bf16.mxu1 %vm440_vm1, %v4130_v33  ;;  %v2138_v33 = vsel %vm294_vm0, %v2135_v18, %v2137_v40 }
  0xe5   : > { %3379 = vmatmul.mubr.msk.bf16.gmra.mrb[20].mxu0 %vm440_vm1, %v4172_v19  ;;  %v2141_v52 = vpack.c.bf16 %v2138_v33, %v2136_v45 }
  0xe6   : > { %3382 = vmatprep.mubr.msk.bf16.mxu0 %vm440_vm1, %v4185_v8 }
  0xeb   : > { %3223 = vmatmul.mubr.msk.bf16.gmra.mrb[8].mxu1 %vm440_vm1, %v4151_v44 }
  0xec   : > { %3226 = vmatprep.mubr.msk.bf16.mxu1 %vm440_vm1, %v4166_v47 }
  0xed   : > { %3383 = vmatmul.mubr.msk.bf16.gmra.mrb[24].mxu0 %vm440_vm1, %v4248_v29 }
  0xee   : > { %3386 = vmatprep.mubr.msk.bf16.mxu0 %vm440_vm1, %v4350_v24 }
  0xf3   : > { %3227 = vmatmul.mubr.msk.bf16.gmra.mrb[12].mxu1 %vm440_vm1, %v4181_v4 }
  0xf4   : > { %3230 = vmatprep.mubr.msk.bf16.mxu1 %vm440_vm1, %v4191_v39 }
  0xf5   : > { %3387 = vmatmul.mubr.msk.bf16.gmra.mrb[28].mxu0 %vm440_vm1, %v2141_v52 }
  0xf6   : > { %3394 = vmatprep.mubr.msk.bf16.mxu0 %vm440_vm1, %v4755_v9 }
  0xfb   : > { %3231 = vmatmul.mubr.msk.bf16.gmra.mrb[16].mxu1 %vm440_vm1, %v4198_v46 }
  0xfc   : > { %3234 = vmatprep.mubr.msk.bf16.mxu1 %vm440_vm1, %v4202_v32 }
  0xfd   : > { %3395 = vmatmul.mubr.msk.bf16.vlgmr.msra.gmra.mrb[0].mxu0 %vm440_vm1, %v4757_v63 }
  0xfe   : > { %3398 = vmatprep.mubr.msk.bf16.mxu0 %vm440_vm1, %v4758_v34 }
 0x103   : > { %3235 = vmatmul.mubr.msk.bf16.gmra.mrb[20].mxu1 %vm440_vm1, %v4206_v13 }
 0x104   : > { %3238 = vmatprep.mubr.msk.bf16.mxu1 %vm440_vm1, %v4210_v56 }
 0x105   : > { %3399 = vmatmul.mubr.msk.bf16.gmra.mrb[4].mxu0 %vm440_vm1, %v4759_v17 }
 0x106   : > { %3402 = vmatprep.mubr.msk.bf16.mxu0 %vm440_vm1, %v4226_v16 }
 0x10b   : > { %3239 = vmatmul.mubr.msk.bf16.gmra.mrb[24].mxu1 %vm440_vm1, %v4214_v55 }
 0x10c   : > { %3242 = vmatprep.mubr.msk.bf16.mxu1 %vm440_vm1, %v4218_v51 }
 0x10d   : > { %3403 = vmatmul.mubr.msk.bf16.gmra.mrb[8].mxu0 %vm440_vm1, %v4233_v37 }
 0x10e   : > { %3406 = vmatprep.mubr.msk.bf16.mxu0 %vm440_vm1, %v4256_v50 }
 0x113   : > { %3243 = vmatmul.mubr.msk.bf16.gmra.mrb[28].mxu1 %vm440_vm1, %v4426_v48 }
 0x114   : > { %3266 = vmatprep.mubr.msk.bf16.mxu1 %vm440_vm1, %v4767_v54 }
 0x115   : > { %3407 = vmatmul.mubr.msk.bf16.gmra.mrb[12].mxu0 %vm440_vm1, %v4260_v2 }
 0x116   : > { %3410 = vmatprep.mubr.msk.bf16.mxu0 %vm440_vm1, %v4280_v27  ;;  %v4596_v27 = vld [vmem:[%s4709_s2] ss:$0 sm:$0xff] }
 0x11b   : > { %3267 = vmatmul.mubr.msk.bf16.vlgmr.msra.gmra.mrb[16].mxu1 %vm440_vm1, %v4768_v60 }
 0x11c   : > { %3270 = vmatprep.mubr.msk.bf16.mxu1 %vm440_vm1, %v4770_v20 }
 0x11d   : > { %3411 = vmatmul.mubr.msk.bf16.gmra.mrb[16].mxu0 %vm440_vm1, %v4284_v35 }
 0x11e   : > { %3414 = vmatprep.mubr.msk.bf16.mxu0 %vm440_vm1, %v4309_v43 }
 0x123   : > { %3271 = vmatmul.mubr.msk.bf16.gmra.mrb[20].mxu1 %vm440_vm1, %v4771_v15 }
 0x124   : > { %3274 = vmatprep.mubr.msk.bf16.mxu1 %vm440_vm1, %v4172_v19 }
 0x125   : > { %3415 = vmatmul.mubr.msk.bf16.gmra.mrb[20].mxu0 %vm440_vm1, %v4313_v57 }
 0x126   : > { %3418 = vmatprep.mubr.msk.bf16.mxu0 %vm440_vm1, %v4334_v1 }
 0x12b   : > { %3275 = vmatmul.mubr.msk.bf16.gmra.mrb[24].mxu1 %vm440_vm1, %v4185_v8 }
 0x12c   : > { %3278 = vmatprep.mubr.msk.bf16.mxu1 %vm440_vm1, %v4248_v29 }
 0x12d   : > { %3419 = vmatmul.mubr.msk.bf16.gmra.mrb[24].mxu0 %vm440_vm1, %v4338_v42 }
 0x12e   : > { %3422 = vmatprep.mubr.msk.bf16.mxu0 %vm440_vm1, %v4352_v62 }
 0x133   : > { %3279 = vmatmul.mubr.msk.bf16.gmra.mrb[28].mxu1 %vm440_vm1, %v4350_v24 }
 0x135   : > { %3423 = vmatmul.mubr.msk.bf16.gmra.mrb[28].mxu0 %vm440_vm1, %v2362_v22 }
 0x1ae   : > { %v3216_v44 = vpop.f32.mrb[0].mxu1 }
 0x1af   : > { %v1313_v37 = vpop.f32.mrb[1].mxu1 }
 0x1b0   : > { %v3217_v47 = vpop.f32.mrb[2].mxu1 }
 0x1b1   : > { %v1316_v19 = vpop.f32.mrb[3].mxu1 }
 0x1b6   : > { %v3220_v4 = vpop.f32.mrb[4].mxu1 }
 0x1b7   : > { %v1329_v8 = vpop.f32.mrb[5].mxu1 }
 0x1b8   : > { %v3221_v39 = vpop.f32.mrb[6].mxu1 }
 0x1b9   : > { %v1332_v46 = vpop.f32.mrb[7].mxu1 }
 0x1be   : > { %v3224_v32 = vpop.f32.mrb[8].mxu1 }
 0x1bf   : > { %v1345_v13 = vpop.f32.mrb[9].mxu1 }
 0x1c0   : > { %v3225_v56 = vpop.f32.mrb[10].mxu1 }
 0x1c1   : > { %v1348_v55 = vpop.f32.mrb[11].mxu1 }
 0x1c6   : > { %v4585_v51 = vpop.f32.mrb[12].mxu1 }
 0x1c7   : > { %v4587_v16 = vpop.f32.mrb[13].mxu1 }
 0x1c8   : > { %v4589_v29 = vpop.f32.mrb[14].mxu1 }
 0x1c9   : > { %v4591_v50 = vpop.f32.mrb[15].mxu1 }
 0x1d0   : > { %v3396_v2 = vpop.f32.mrb[0].mxu0 }
 0x1d1   : > { %v3430_v35 = vadd.f32 %v3396_v2, %v3216_v44  ;;  %v2417_v43 = vpop.f32.mrb[1].mxu0 }
 0x1d2   : > { %v3431_v57 = vadd.f32 %v2417_v43, %v1313_v37  ;;  %v3397_v1 = vpop.f32.mrb[2].mxu0 }
 0x1d3   : > { %v2585_v42 = vadd.f32 %v3430_v35, %v4596_v27  ;;  %v3432_v59 = vadd.f32 %v3397_v1, %v3217_v47  ;;  %v2420_v24 = vpop.f32.mrb[3].mxu0 }
 0x1d4   : > { %v2583_v62 = vadd.f32 %v3431_v57, %v4596_v27  ;;  %v3433_v5 = vadd.f32 %v2420_v24, %v1316_v19 }
 0x1d5   : > { %v2617_v30 = vmax.f32 %v2585_v42, 0.0  ;;  %v2586_v0 = vadd.f32 %v3432_v59, %v4596_v27 }
 0x1d6   : > { %v2615_v9 = vmax.f32 %v2583_v62, 0.0  ;;  %v2584_v28 = vadd.f32 %v3433_v5, %v4596_v27 }
 0x1d7   : > { %2649 = vst.msk [vmem:[%s4603_s7 + $0x10] sm:$0xff] %vm440_vm1, %v2617_v30  ;;  %v2618_v63 = vmax.f32 %v2586_v0, 0.0 }
 0x1d8   : > { %2647 = vst.msk [vmem:[%s4603_s7] sm:$0xff] %vm440_vm1, %v2615_v9  ;;  %v2616_v34 = vmax.f32 %v2584_v28, 0.0  ;;  %v3400_v17 = vpop.f32.mrb[4].mxu0 }
 0x1d9   : > { %2650 = vst.msk [vmem:[%s4603_s7 + $0x18] sm:$0xff] %vm440_vm1, %v2618_v63  ;;  %v3434_v48 = vadd.f32 %v3400_v17, %v3220_v4  ;;  %v2433_v23 = vpop.f32.mrb[5].mxu0 }
 0x1da   : > { %2648 = vst.msk [vmem:[%s4603_s7 + $0x8] sm:$0xff] %vm440_vm1, %v2616_v34  ;;  %v3435_v61 = vadd.f32 %v2433_v23, %v1329_v8  ;;  %v3401_v38 = vpop.f32.mrb[6].mxu0 }
 0x1db   : > { %v2589_v25 = vadd.f32 %v3434_v48, %v4596_v27  ;;  %v3436_v12 = vadd.f32 %v3401_v38, %v3221_v39  ;;  %v2436_v49 = vpop.f32.mrb[7].mxu0 }
 0x1dc   : > { %v2587_v14 = vadd.f32 %v3435_v61, %v4596_v27  ;;  %v3437_v36 = vadd.f32 %v2436_v49, %v1332_v46 }
 0x1dd   : > { %v2621_v11 = vmax.f32 %v2589_v25, 0.0  ;;  %v2590_v22 = vadd.f32 %v3436_v12, %v4596_v27 }
 0x1de   : > { %v2619_v31 = vmax.f32 %v2587_v14, 0.0  ;;  %v2588_v3 = vadd.f32 %v3437_v36, %v4596_v27 }
 0x1df   : > { %2653 = vst.msk [vmem:[%s4603_s7 + $0x30] sm:$0xff] %vm440_vm1, %v2621_v11  ;;  %v2622_v21 = vmax.f32 %v2590_v22, 0.0 }
 0x1e0   : > { %2651 = vst.msk [vmem:[%s4603_s7 + $0x20] sm:$0xff] %vm440_vm1, %v2619_v31  ;;  %v2620_v41 = vmax.f32 %v2588_v3, 0.0  ;;  %v3404_v6 = vpop.f32.mrb[8].mxu0 }
 0x1e1   : > { %2654 = vst.msk [vmem:[%s4603_s7 + $0x38] sm:$0xff] %vm440_vm1, %v2622_v21  ;;  %v3438_v7 = vadd.f32 %v3404_v6, %v3224_v32  ;;  %v2449_v26 = vpop.f32.mrb[9].mxu0 }
 0x1e2   : > { %2652 = vst.msk [vmem:[%s4603_s7 + $0x28] sm:$0xff] %vm440_vm1, %v2620_v41  ;;  %v3439_v53 = vadd.f32 %v2449_v26, %v1345_v13  ;;  %v3405_v54 = vpop.f32.mrb[10].mxu0 }
 0x1e3   : > { %v2593_v60 = vadd.f32 %v3438_v7, %v4596_v27  ;;  %v3440_v10 = vadd.f32 %v3405_v54, %v3225_v56  ;;  %v2452_v20 = vpop.f32.mrb[11].mxu0 }
 0x1e4   : > { %v2591_v15 = vadd.f32 %v3439_v53, %v4596_v27  ;;  %v3441_v58 = vadd.f32 %v2452_v20, %v1348_v55 }
 0x1e5   : > { %v2625_v18 = vmax.f32 %v2593_v60, 0.0  ;;  %v2594_v40 = vadd.f32 %v3440_v10, %v4596_v27 }
 0x1e6   : > { %v2623_v45 = vmax.f32 %v2591_v15, 0.0  ;;  %v2592_v33 = vadd.f32 %v3441_v58, %v4596_v27 }
 0x1e7   : > { %2657 = vst.msk [vmem:[%s4603_s7 + $0x50] sm:$0xff] %vm440_vm1, %v2625_v18  ;;  %v2626_v52 = vmax.f32 %v2594_v40, 0.0 }
 0x1e8   : > { %2655 = vst.msk [vmem:[%s4603_s7 + $0x40] sm:$0xff] %vm440_vm1, %v2623_v45  ;;  %v2624_v44 = vmax.f32 %v2592_v33, 0.0  ;;  %v3408_v37 = vpop.f32.mrb[12].mxu0 }
 0x1e9   : > { %2658 = vst.msk [vmem:[%s4603_s7 + $0x58] sm:$0xff] %vm440_vm1, %v2626_v52  ;;  %v3442_v47 = vadd.f32 %v3408_v37, %v4585_v51  ;;  %v2465_v19 = vpop.f32.mrb[13].mxu0 }
 0x1ea   : > { %2656 = vst.msk [vmem:[%s4603_s7 + $0x48] sm:$0xff] %vm440_vm1, %v2624_v44  ;;  %v3443_v4 = vadd.f32 %v2465_v19, %v4587_v16  ;;  %v3409_v8 = vpop.f32.mrb[14].mxu0 }
 0x1eb   : > { %v2597_v39 = vadd.f32 %v3442_v47, %v4596_v27  ;;  %v3444_v46 = vadd.f32 %v3409_v8, %v4589_v29  ;;  %v2468_v32 = vpop.f32.mrb[15].mxu0 }
 0x1ec   : > { %v2595_v13 = vadd.f32 %v3443_v4, %v4596_v27  ;;  %v3445_v56 = vadd.f32 %v2468_v32, %v4591_v50 }
 0x1ed   : > { %v2629_v55 = vmax.f32 %v2597_v39, 0.0  ;;  %v2598_v51 = vadd.f32 %v3444_v46, %v4596_v27 }
 0x1ee   : > { %v3268_v2 = vpop.f32.mrb[16].mxu1  ;;  %v2627_v35 = vmax.f32 %v2595_v13, 0.0  ;;  %v2596_v16 = vadd.f32 %v3445_v56, %v4596_v27 }
 0x1ef   : > { %v1601_v43 = vpop.f32.mrb[17].mxu1  ;;  %2661 = vst.msk [vmem:[%s4603_s7 + $0x70] sm:$0xff] %vm440_vm1, %v2629_v55  ;;  %v2630_v57 = vmax.f32 %v2598_v51, 0.0 }
 0x1f0   : > { %v3269_v1 = vpop.f32.mrb[18].mxu1  ;;  %2659 = vst.msk [vmem:[%s4603_s7 + $0x60] sm:$0xff] %vm440_vm1, %v2627_v35  ;;  %v2628_v29 = vmax.f32 %v2596_v16, 0.0  ;;  %v3412_v42 = vpop.f32.mrb[16].mxu0 }
 0x1f1   : > { %v1604_v59 = vpop.f32.mrb[19].mxu1  ;;  %2662 = vst.msk [vmem:[%s4603_s7 + $0x78] sm:$0xff] %vm440_vm1, %v2630_v57  ;;  %v3446_v50 = vadd.f32 %v3412_v42, %v3268_v2  ;;  %v2481_v24 = vpop.f32.mrb[17].mxu0 }
 0x1f2   : > { %2660 = vst.msk [vmem:[%s4603_s7 + $0x68] sm:$0xff] %vm440_vm1, %v2628_v29  ;;  %v3447_v62 = vadd.f32 %v2481_v24, %v1601_v43  ;;  %v3413_v5 = vpop.f32.mrb[18].mxu0 }
 0x1f3   : > { %v2601_v30 = vadd.f32 %v3446_v50, %v4596_v27  ;;  %v3448_v0 = vadd.f32 %v3413_v5, %v3269_v1  ;;  %v2484_v9 = vpop.f32.mrb[19].mxu0 }
 0x1f4   : > { %v2599_v28 = vadd.f32 %v3447_v62, %v4596_v27  ;;  %v3449_v63 = vadd.f32 %v2484_v9, %v1604_v59 }
 0x1f5   : > { %v2633_v34 = vmax.f32 %v2601_v30, 0.0  ;;  %v2602_v17 = vadd.f32 %v3448_v0, %v4596_v27 }
 0x1f6   : > { %v3272_v48 = vpop.f32.mrb[20].mxu1  ;;  %v2631_v23 = vmax.f32 %v2599_v28, 0.0  ;;  %v2600_v61 = vadd.f32 %v3449_v63, %v4596_v27 }
 0x1f7   : > { %v1617_v38 = vpop.f32.mrb[21].mxu1  ;;  %2665 = vst.msk [vmem:[%s4603_s7 + $0x90] sm:$0xff] %vm440_vm1, %v2633_v34  ;;  %v2634_v25 = vmax.f32 %v2602_v17, 0.0 }
 0x1f8   : > { %v3273_v12 = vpop.f32.mrb[22].mxu1  ;;  %2663 = vst.msk [vmem:[%s4603_s7 + $0x80] sm:$0xff] %vm440_vm1, %v2631_v23  ;;  %v2632_v49 = vmax.f32 %v2600_v61, 0.0  ;;  %v3416_v14 = vpop.f32.mrb[20].mxu0 }
 0x1f9   : > { %v1620_v36 = vpop.f32.mrb[23].mxu1  ;;  %2666 = vst.msk [vmem:[%s4603_s7 + $0x98] sm:$0xff] %vm440_vm1, %v2634_v25  ;;  %v3450_v11 = vadd.f32 %v3416_v14, %v3272_v48  ;;  %v2497_v22 = vpop.f32.mrb[21].mxu0 }
 0x1fa   : > { %2664 = vst.msk [vmem:[%s4603_s7 + $0x88] sm:$0xff] %vm440_vm1, %v2632_v49  ;;  %v3451_v31 = vadd.f32 %v2497_v22, %v1617_v38  ;;  %v3417_v3 = vpop.f32.mrb[22].mxu0 }
 0x1fb   : > { %v2605_v21 = vadd.f32 %v3450_v11, %v4596_v27  ;;  %v3452_v41 = vadd.f32 %v3417_v3, %v3273_v12  ;;  %v2500_v6 = vpop.f32.mrb[23].mxu0 }
 0x1fc   : > { %v2603_v7 = vadd.f32 %v3451_v31, %v4596_v27  ;;  %v3453_v26 = vadd.f32 %v2500_v6, %v1620_v36 }
 0x1fd   : > { %v2637_v53 = vmax.f32 %v2605_v21, 0.0  ;;  %v2606_v54 = vadd.f32 %v3452_v41, %v4596_v27 }
 0x1fe   : > { %v3276_v60 = vpop.f32.mrb[24].mxu1  ;;  %v2635_v10 = vmax.f32 %v2603_v7, 0.0  ;;  %v2604_v20 = vadd.f32 %v3453_v26, %v4596_v27 }
 0x1ff   : > { %v1633_v15 = vpop.f32.mrb[25].mxu1  ;;  %2669 = vst.msk [vmem:[%s4603_s7 + $0xb0] sm:$0xff] %vm440_vm1, %v2637_v53  ;;  %v2638_v58 = vmax.f32 %v2606_v54, 0.0 }
 0x200   : > { %v3277_v18 = vpop.f32.mrb[26].mxu1  ;;  %2667 = vst.msk [vmem:[%s4603_s7 + $0xa0] sm:$0xff] %vm440_vm1, %v2635_v10  ;;  %v2636_v40 = vmax.f32 %v2604_v20, 0.0  ;;  %v3420_v45 = vpop.f32.mrb[24].mxu0 }
 0x201   : > { %v1636_v33 = vpop.f32.mrb[27].mxu1  ;;  %2670 = vst.msk [vmem:[%s4603_s7 + $0xb8] sm:$0xff] %vm440_vm1, %v2638_v58  ;;  %v3454_v52 = vadd.f32 %v3420_v45, %v3276_v60  ;;  %v2513_v44 = vpop.f32.mrb[25].mxu0 }
 0x202   : > { %2668 = vst.msk [vmem:[%s4603_s7 + $0xa8] sm:$0xff] %vm440_vm1, %v2636_v40  ;;  %v3455_v37 = vadd.f32 %v2513_v44, %v1633_v15  ;;  %v3421_v47 = vpop.f32.mrb[26].mxu0 }
 0x203   : > { %v2609_v19 = vadd.f32 %v3454_v52, %v4596_v27  ;;  %v3456_v4 = vadd.f32 %v3421_v47, %v3277_v18  ;;  %v2516_v8 = vpop.f32.mrb[27].mxu0 }
 0x204   : > { %v2607_v39 = vadd.f32 %v3455_v37, %v4596_v27  ;;  %v3457_v46 = vadd.f32 %v2516_v8, %v1636_v33 }
 0x205   : > { %v2641_v32 = vmax.f32 %v2609_v19, 0.0  ;;  %v2610_v13 = vadd.f32 %v3456_v4, %v4596_v27 }
 0x206   : > { %v3280_v56 = vpop.f32.mrb[28].mxu1  ;;  %v2639_v55 = vmax.f32 %v2607_v39, 0.0  ;;  %v2608_v51 = vadd.f32 %v3457_v46, %v4596_v27 }
 0x207   : > { %v1649_v2 = vpop.f32.mrb[29].mxu1  ;;  %2673 = vst.msk [vmem:[%s4603_s7 + $0xd0] sm:$0xff] %vm440_vm1, %v2641_v32  ;;  %v2642_v35 = vmax.f32 %v2610_v13, 0.0 }
 0x208   : > { %v3281_v16 = vpop.f32.mrb[30].mxu1  ;;  %2671 = vst.msk [vmem:[%s4603_s7 + $0xc0] sm:$0xff] %vm440_vm1, %v2639_v55  ;;  %v2640_v43 = vmax.f32 %v2608_v51, 0.0  ;;  %v3424_v57 = vpop.f32.mrb[28].mxu0 }
 0x209   : > { %v1652_v1 = vpop.f32.mrb[31].mxu1  ;;  %2674 = vst.msk [vmem:[%s4603_s7 + $0xd8] sm:$0xff] %vm440_vm1, %v2642_v35  ;;  %v3458_v29 = vadd.f32 %v3424_v57, %v3280_v56  ;;  %v2529_v42 = vpop.f32.mrb[29].mxu0 }
 0x20a   : > { %2672 = vst.msk [vmem:[%s4603_s7 + $0xc8] sm:$0xff] %vm440_vm1, %v2640_v43  ;;  %v3459_v59 = vadd.f32 %v2529_v42, %v1649_v2  ;;  %v3425_v50 = vpop.f32.mrb[30].mxu0 }
 0x20b   : > { %v2613_v24 = vadd.f32 %v3458_v29, %v4596_v27  ;;  %v3460_v62 = vadd.f32 %v3425_v50, %v3281_v16  ;;  %v2532_v5 = vpop.f32.mrb[31].mxu0 }
 0x20c   : > { %v2611_v30 = vadd.f32 %v3459_v59, %v4596_v27  ;;  %v3461_v0 = vadd.f32 %v2532_v5, %v1652_v1 }
 0x20d   : > { %v2645_v9 = vmax.f32 %v2613_v24, 0.0  ;;  %v2614_v28 = vadd.f32 %v3460_v62, %v4596_v27 }
 0x20e   : > { %v2643_v63 = vmax.f32 %v2611_v30, 0.0  ;;  %v2612_v34 = vadd.f32 %v3461_v0, %v4596_v27 }
 0x20f   : > { %2677 = vst.msk [vmem:[%s4603_s7 + $0xf0] sm:$0xff] %vm440_vm1, %v2645_v9  ;;  %v2646_v17 = vmax.f32 %v2614_v28, 0.0 }
 0x210   : > { %2675 = vst.msk [vmem:[%s4603_s7 + $0xe0] sm:$0xff] %vm440_vm1, %v2643_v63  ;;  %v2644_v48 = vmax.f32 %v2612_v34, 0.0 }
 0x211   : > { %2678 = vst.msk [vmem:[%s4603_s7 + $0xf8] sm:$0xff] %vm440_vm1, %v2646_v17 }
 0x212   : > { %2676 = vst.msk [vmem:[%s4603_s7 + $0xe8] sm:$0xff] %vm440_vm1, %v2644_v48 }
 0x213 PF: > { %s13_s12 = sadd.s32 1, %s3719_s12  }
 0x214   : > { %p10_p4 = scmp.ge.s32.totalorder %s13_s12, 4  }
 0x216   :  { %12 = sbr.rel (!%p10_p4) target bundleno = 1 (0x1), region = 70 }

</bundles_post_ra>
